<compile_context>
chip_gen: v7x
topology: tpu7x:2x2x1
jax: 0.10.0
libtpu: 0.0.40
codegen_flags: <defaults>
</compile_context>

<pallas_src>
import functools

import jax
import jax.numpy as jnp
from jax import lax
from jax.experimental import pallas as pl
from jax.experimental.pallas import tpu as pltpu


# ----------------------------- Pallas kernel ------------------------------- #
def _lstm_head_kernel(
    embeds_ref,                      # (1, T*Bc, E) bf16 block (time-major within chunk)
    w_ih0_ref, w_hh0_ref, b0_ref,    # (E,4H) bf16, (H,4H) bf16, (1,4H) f32
    w_ih1_ref, w_hh1_ref, b1_ref,    # (H,4H) bf16, (H,4H) bf16, (1,4H) f32
    w_ih2_ref, w_hh2_ref, b2_ref,    # (H,4H) bf16, (H,4H) bf16, (1,4H) f32
    fcw_ref, fcb_ref,                # (8,H) f32 (row 0 = fc_w^T), (1,1) f32
    out_ref,                         # (1, 1, Bc) f32 — lane-dense output row
    h_scratch,                       # (T*Bc, H) bf16 or f32 VMEM scratch (reused per layer)
    *, n_chains,
):
    Bc = out_ref.shape[2]
    TB = embeds_ref.shape[1]
    T = TB // Bc
    H = w_hh0_ref.shape[0]
    Bs = Bc // n_chains              # rows per independent sub-chain

    def run_layer(gates_pre, w_hh_bf16, store_h):
        """gates_pre: (T*Bc, 4H) f32 precomputed x@W_ih + b (g-gate cols
        pre-scaled by 2).  Serial recurrence fully unrolled; n_chains
        independent batch sub-chains interleaved so MXU / VPU+EUP work of
        different chains overlaps."""
        hs = [jnp.zeros((Bs, H), jnp.float32) for _ in range(n_chains)]
        cs = [jnp.zeros((Bs, H), jnp.float32) for _ in range(n_chains)]
        for t in range(T):
            for s in range(n_chains):
                row0 = t * Bc + s * Bs
                g = gates_pre[row0:row0 + Bs, :]
                if t > 0:  # h == 0 at t == 0 -> recurrent dot would be zeros
                    g = g + jnp.dot(hs[s].astype(jnp.bfloat16), w_hh_bf16,
                                    preferred_element_type=jnp.float32)
                # Single full-width transcendental: sigmoid over (Bs, 4H);
                # tanh of the g-gate derived as 2*sigmoid(2x) - 1 (weights of
                # that gate were pre-scaled by 2 in the wrapper).
                sig = jax.nn.sigmoid(g)                  # (Bs, 4H)
                i_g = sig[:, 0 * H:1 * H]
                f_g = sig[:, 1 * H:2 * H]
                g_g = 2.0 * sig[:, 2 * H:3 * H] - 1.0    # == tanh(pre_g)
                o_g = sig[:, 3 * H:4 * H]
                cs[s] = f_g * cs[s] + i_g * g_g
                hs[s] = o_g * jnp.tanh(cs[s])
                if store_h:
                    h_scratch[pl.ds(row0, Bs), :] = hs[s].astype(h_scratch.dtype)
        if n_chains == 1:
            return hs[0]
        return jnp.concatenate(hs, axis=0)               # (Bc, H), local-batch order

    # ---- Layer 0: batched input projection over all timesteps at once ---- #
    x_flat = embeds_ref[0]                                            # (T*Bc, E) bf16
    gates0 = jnp.dot(x_flat, w_ih0_ref[...],
                     preferred_element_type=jnp.float32) + b0_ref[...]
    run_layer(gates0, w_hh0_ref[...], store_h=True)

    # ---- Layer 1 ---- #
    h0_all = h_scratch[...].astype(jnp.bfloat16)                      # (T*Bc, H)
    gates1 = jnp.dot(h0_all, w_ih1_ref[...],
                     preferred_element_type=jnp.float32) + b1_ref[...]
    run_layer(gates1, w_hh1_ref[...], store_h=True)

    # ---- Layer 2 (only the final hidden state is needed) ---- #
    h1_all = h_scratch[...].astype(jnp.bfloat16)                      # (T*Bc, H)
    gates2 = jnp.dot(h1_all, w_ih2_ref[...],
                     preferred_element_type=jnp.float32) + b2_ref[...]
    h2 = run_layer(gates2, w_hh2_ref[...], store_h=False)             # (Bc, H)

    # ---- Head: fc1 + sigmoid, lane-dense (1, Bc) row output ---- #
    # (8,H) x (Bc,H)^T -> (8, Bc); row 0 holds the real logits.
    logits8 = lax.dot_general(fcw_ref[...], h2,
                              (((1,), (1,)), ((), ())),
                              preferred_element_type=jnp.float32)
    out_ref[0] = jax.nn.sigmoid(logits8[0:1, :] + fcb_ref[...])       # (1, Bc) dense store


# ------------------------------ Wrapper ------------------------------------ #
def make_params(embedding_dim, hidden_dim, vocab_size, key):
    """Deterministic synthetic parameter init (shapes match nn.Embedding /
    nn.LSTM(embedding_dim, hidden_dim, 3) / nn.Linear(hidden_dim, 1)).
    LSTM weights stored pre-transposed to (in_features, 4*H), PyTorch gate
    order [i | f | g | o]; biases fused as b_ih + b_hh."""
    H = hidden_dim
    keys = jax.random.split(key, 16)
    scale = 1.0 / jnp.sqrt(jnp.float32(H))

    def unif(k, shape):
        return jax.random.uniform(k, shape, jnp.float32, -scale, scale)

    params = {
        "embedding": jax.random.normal(keys[0], (vocab_size, embedding_dim), jnp.float32) * 0.1,
        "w_ih0": unif(keys[1], (embedding_dim, 4 * H)),
        "w_hh0": unif(keys[2], (H, 4 * H)),
        "b0":    unif(keys[3], (1, 4 * H)) + unif(keys[4], (1, 4 * H)),
        "w_ih1": unif(keys[5], (H, 4 * H)),
        "w_hh1": unif(keys[6], (H, 4 * H)),
        "b1":    unif(keys[7], (1, 4 * H)) + unif(keys[8], (1, 4 * H)),
        "w_ih2": unif(keys[9], (H, 4 * H)),
        "w_hh2": unif(keys[10], (H, 4 * H)),
        "b2":    unif(keys[11], (1, 4 * H)) + unif(keys[12], (1, 4 * H)),
        "fc_w":  unif(keys[13], (H, 1)),
        "fc_b":  unif(keys[14], (1, 1)),
    }
    return params


def _round_up(x, m):
    return ((x + m - 1) // m) * m


def _choose_tiling(B):
    """Pick batch-chunk Bc and padded batch.  Bc up to 128 (MXU-row filling),
    at least 2 chunks when the batch allows (v7x megacore), multiple of 16 so
    the chunk splits into two 8-sublane-aligned interleaved chains."""
    B8 = _round_up(max(B, 1), 8)
    if B8 <= 8:
        Bc = 8
    else:
        Bc = min(128, _round_up(B8 // 2, 16))
    B_pad = _round_up(B8, Bc)
    return Bc, B_pad


def _prescale_g_gate(w):
    """Scale the g-gate (3rd quarter of the last dim) by 2 so that the kernel
    can compute tanh(x) as 2*sigmoid(2x)-1 with a single sigmoid pass."""
    H4 = w.shape[-1]
    H = H4 // 4
    return w.at[..., 2 * H:3 * H].multiply(2.0)


def question_detector_forward(packed_tokens, batch_sizes, params):
    """packed_tokens: (T*B,) int32 time-major packed token ids.
    batch_sizes: (T,) int32, assumed constant (equal-length sequences).
    Returns (B, 1) float32 probabilities."""
    T = batch_sizes.shape[0]                      # static under jit
    if packed_tokens.shape[0] % T != 0:
        raise ValueError("packed_tokens length must be T * B (equal-length sequences assumed)")
    B = packed_tokens.shape[0] // T               # static under jit
    E = params["embedding"].shape[1]
    H = params["w_hh0"].shape[0]
    H4 = 4 * H

    Bc, B_pad = _choose_tiling(B)
    nB = B_pad // Bc
    n_chains = 2 if Bc >= 16 else 1
    Bs = Bc // n_chains
    # bf16 inter-layer scratch only when every store offset is 16-sublane aligned.
    scratch_dtype = jnp.bfloat16 if (Bs % 16 == 0) else jnp.float32

    # Reorder the *int32 tokens* (cheap) into the kernel layout, then gather:
    # chunk-major, time-major within chunk -> (nB, T*Bc).
    tokens = packed_tokens.reshape(T, B)
    if B_pad != B:
        tokens = jnp.pad(tokens, ((0, 0), (0, B_pad - B)))
    tokens = tokens.reshape(T, nB, Bc).transpose(1, 0, 2).reshape(nB, T * Bc)

    # Embedding lookup (gather) — glue in plain JAX; cast to bf16 for the MXU.
    embeds = jnp.take(params["embedding"], tokens, axis=0).astype(jnp.bfloat16)  # (nB,T*Bc,E)

    bf = lambda w: w.astype(jnp.bfloat16)
    w_ih0 = bf(_prescale_g_gate(params["w_ih0"]))
    w_hh0 = bf(_prescale_g_gate(params["w_hh0"]))
    b0 = _prescale_g_gate(params["b0"])
    w_ih1 = bf(_prescale_g_gate(params["w_ih1"]))
    w_hh1 = bf(_prescale_g_gate(params["w_hh1"]))
    b1 = _prescale_g_gate(params["b1"])
    w_ih2 = bf(_prescale_g_gate(params["w_ih2"]))
    w_hh2 = bf(_prescale_g_gate(params["w_hh2"]))
    b2 = _prescale_g_gate(params["b2"])
    # Head weight as an 8-row slab (row 0 = fc_w^T) so the head dot is a
    # well-shaped transposed matmul producing a lane-dense (., Bc) row.
    fcw8 = jnp.zeros((8, H), jnp.float32).at[0].set(params["fc_w"][:, 0])
    fcb = params["fc_b"]

    in_specs = [
        pl.BlockSpec((1, T * Bc, E), lambda i: (i, 0, 0)),   # embeds chunk
        pl.BlockSpec((E, H4), lambda i: (0, 0)),             # w_ih0
        pl.BlockSpec((H, H4), lambda i: (0, 0)),             # w_hh0
        pl.BlockSpec((1, H4), lambda i: (0, 0)),             # b0
        pl.BlockSpec((H, H4), lambda i: (0, 0)),             # w_ih1
        pl.BlockSpec((H, H4), lambda i: (0, 0)),             # w_hh1
        pl.BlockSpec((1, H4), lambda i: (0, 0)),             # b1
        pl.BlockSpec((H, H4), lambda i: (0, 0)),             # w_ih2
        pl.BlockSpec((H, H4), lambda i: (0, 0)),             # w_hh2
        pl.BlockSpec((1, H4), lambda i: (0, 0)),             # b2
        pl.BlockSpec((8, H), lambda i: (0, 0)),              # fc_w (8-row slab)
        pl.BlockSpec((1, 1), lambda i: (0, 0)),              # fc_b
    ]
    out_spec = pl.BlockSpec((1, 1, Bc), lambda i: (i, 0, 0))  # lane-dense row per chunk

    kernel = functools.partial(_lstm_head_kernel, n_chains=n_chains)

    out = pl.pallas_call(
        kernel,
        out_shape=jax.ShapeDtypeStruct((nB, 1, Bc), jnp.float32),
        grid=(nB,),
        in_specs=in_specs,
        out_specs=out_spec,
        scratch_shapes=[pltpu.VMEM((T * Bc, H), scratch_dtype)],
        compiler_params=pltpu.CompilerParams(
            dimension_semantics=("parallel",),
        ),
    )(
        embeds,
        w_ih0, w_hh0, b0,
        w_ih1, w_hh1, b1,
        w_ih2, w_hh2, b2,
        fcw8, fcb,
    )
    return out.reshape(B_pad, 1)[:B]


# ------------------------- Pure-JAX f32 reference --------------------------- #
def question_detector_reference(packed_tokens, batch_sizes, params):
    T = batch_sizes.shape[0]
    B = packed_tokens.shape[0] // T
    H = params["w_hh0"].shape[0]
    tokens = packed_tokens.reshape(T, B)
    x = jnp.take(params["embedding"], tokens, axis=0)     # (T, B, E)

    def layer(x_seq, w_ih, w_hh, b):
        def step(carry, x_t):
            h, c = carry
            g = x_t @ w_ih + h @ w_hh + b
            i = jax.nn.sigmoid(g[:, 0 * H:1 * H])
            f = jax.nn.sigmoid(g[:, 1 * H:2 * H])
            gg = jnp.tanh(g[:, 2 * H:3 * H])
            o = jax.nn.sigmoid(g[:, 3 * H:4 * H])
            c = f * c + i * gg
            h = o * jnp.tanh(c)
            return (h, c), h
        init = (jnp.zeros((B, H), jnp.float32), jnp.zeros((B, H), jnp.float32))
        _, hs = lax.scan(step, init, x_seq)
        return hs

    h = layer(x, params["w_ih0"], params["w_hh0"], params["b0"])
    h = layer(h, params["w_ih1"], params["w_hh1"], params["b1"])
    h = layer(h, params["w_ih2"], params["w_hh2"], params["b2"])
    logits = h[-1] @ params["fc_w"] + params["fc_b"]
    return jax.nn.sigmoid(logits)


# ------------------------------ Demo ---------------------------------------- #
if __name__ == "__main__":
    embedding_dim = 16
    hidden_dim = 32
    vocab_size = 50

    key = jax.random.PRNGKey(0)
    k_tok1, k_tok2, k_par = jax.random.split(key, 3)
    params = make_params(embedding_dim, hidden_dim, vocab_size, k_par)

    fwd = jax.jit(question_detector_forward)
    ref_fn = jax.jit(question_detector_reference)

    # Two configs: tiny single-chunk path, and multi-chunk / dual-chain path.
    for k_tok, (T, B) in ((k_tok1, (8, 4)), (k_tok2, (8, 48))):
        packed_tokens = jax.random.randint(k_tok, (T * B,), 0, vocab_size, dtype=jnp.int32)
        batch_sizes = jnp.full((T,), B, dtype=jnp.int32)

        out = jax.block_until_ready(fwd(packed_tokens, batch_sizes, params))
        ref = jax.block_until_ready(ref_fn(packed_tokens, batch_sizes, params))

        assert out.shape == (B, 1)
        assert bool(jnp.all(jnp.isfinite(out)))
        assert bool(jnp.all((out >= 0.0) & (out <= 1.0)))
        err = float(jnp.max(jnp.abs(out - ref)))
        assert err < 3e-2, f"kernel deviates from f32 reference by {err}"

    print("KERNEL_OK")
</pallas_src>

<mosaic_0001>
module attributes {stable_mosaic.version = 11 : i64} {
  func.func @_lstm_head_kernel(%arg0: i32, %arg1: memref<1x64x16xbf16, #tpu.memory_space<vmem>>, %arg2: memref<16x128xbf16, #tpu.memory_space<vmem>>, %arg3: memref<32x128xbf16, #tpu.memory_space<vmem>>, %arg4: memref<1x128xf32, #tpu.memory_space<vmem>>, %arg5: memref<32x128xbf16, #tpu.memory_space<vmem>>, %arg6: memref<32x128xbf16, #tpu.memory_space<vmem>>, %arg7: memref<1x128xf32, #tpu.memory_space<vmem>>, %arg8: memref<32x128xbf16, #tpu.memory_space<vmem>>, %arg9: memref<32x128xbf16, #tpu.memory_space<vmem>>, %arg10: memref<1x128xf32, #tpu.memory_space<vmem>>, %arg11: memref<8x32xf32, #tpu.memory_space<vmem>>, %arg12: memref<1x1xf32, #tpu.memory_space<vmem>>, %arg13: memref<1x1x8xf32, #tpu.memory_space<vmem>>, %arg14: memref<64x32xf32, #tpu.memory_space<vmem>>) attributes {dimension_semantics = [#tpu.dimension_semantics<parallel>], iteration_bounds = array<i64: 1>, scalar_prefetch = 0 : i64, scratch_operands = 1 : i64, tpu.core_type = #tpu.core_type<tc>, window_params = [{transform_indices = @transform_0, window_bounds = array<i64: 1, 64, 16>}, {pipeline_mode = #tpu.pipeline_mode<synchronous>, transform_indices = @transform_1, window_bounds = array<i64: 16, 128>}, {pipeline_mode = #tpu.pipeline_mode<synchronous>, transform_indices = @transform_2, window_bounds = array<i64: 32, 128>}, {pipeline_mode = #tpu.pipeline_mode<synchronous>, transform_indices = @transform_3, window_bounds = array<i64: 1, 128>}, {pipeline_mode = #tpu.pipeline_mode<synchronous>, transform_indices = @transform_4, window_bounds = array<i64: 32, 128>}, {pipeline_mode = #tpu.pipeline_mode<synchronous>, transform_indices = @transform_5, window_bounds = array<i64: 32, 128>}, {pipeline_mode = #tpu.pipeline_mode<synchronous>, transform_indices = @transform_6, window_bounds = array<i64: 1, 128>}, {pipeline_mode = #tpu.pipeline_mode<synchronous>, transform_indices = @transform_7, window_bounds = array<i64: 32, 128>}, {pipeline_mode = #tpu.pipeline_mode<synchronous>, transform_indices = @transform_8, window_bounds = array<i64: 32, 128>}, {pipeline_mode = #tpu.pipeline_mode<synchronous>, transform_indices = @transform_9, window_bounds = array<i64: 1, 128>}, {pipeline_mode = #tpu.pipeline_mode<synchronous>, transform_indices = @transform_10, window_bounds = array<i64: 8, 32>}, {pipeline_mode = #tpu.pipeline_mode<synchronous>, transform_indices = @transform_11, window_bounds = array<i64: 1, 1>}, {transform_indices = @transform_12, window_bounds = array<i64: 1, 1, 8>}]} {
    %c0 = arith.constant 0 : index
    %c0_0 = arith.constant 0 : index
    %c0_1 = arith.constant 0 : index
    %0 = vector.load %arg1[%c0, %c0_0, %c0_1] : memref<1x64x16xbf16, #tpu.memory_space<vmem>>, vector<1x64x16xbf16>
    %1 = vector.shape_cast %0 : vector<1x64x16xbf16> to vector<64x16xbf16>
    %c0_2 = arith.constant 0 : index
    %c0_3 = arith.constant 0 : index
    %2 = vector.load %arg2[%c0_2, %c0_3] : memref<16x128xbf16, #tpu.memory_space<vmem>>, vector<16x128xbf16>
    %cst = arith.constant dense<0.000000e+00> : vector<64x128xf32>
    %3 = tpu.matmul %1, %2, %cst {dimension_numbers = #tpu.dot_dimension_numbers<[1], [0], [0], [1], [0, 0, 1, 1], [], []>} : vector<64x16xbf16>, vector<16x128xbf16>, vector<64x128xf32> -> vector<64x128xf32>
    %c0_4 = arith.constant 0 : index
    %c0_5 = arith.constant 0 : index
    %4 = vector.load %arg4[%c0_4, %c0_5] : memref<1x128xf32, #tpu.memory_space<vmem>>, vector<1x128xf32>
    %5 = vector.broadcast %4 : vector<1x128xf32> to vector<64x128xf32>
    %6 = arith.addf %3, %5 : vector<64x128xf32>
    %c0_6 = arith.constant 0 : index
    %c0_7 = arith.constant 0 : index
    %7 = vector.load %arg3[%c0_6, %c0_7] : memref<32x128xbf16, #tpu.memory_space<vmem>>, vector<32x128xbf16>
    %cst_8 = arith.constant 0.000000e+00 : f32
    %8 = vector.broadcast %cst_8 : f32 to vector<8x32xf32>
    %9 = vector.extract_strided_slice %6 {offsets = [0, 0], sizes = [8, 128], strides = [1, 1]} : vector<64x128xf32> to vector<8x128xf32>
    %10 = arith.negf %9 : vector<8x128xf32>
    %11 = math.exp %10 : vector<8x128xf32>
    %cst_9 = arith.constant 1.000000e+00 : f32
    %12 = vector.broadcast %cst_9 : f32 to vector<8x128xf32>
    %13 = arith.addf %12, %11 : vector<8x128xf32>
    %14 = arith.divf %12, %13 : vector<8x128xf32>
    %15 = vector.extract_strided_slice %14 {offsets = [0, 0], sizes = [8, 32], strides = [1, 1]} : vector<8x128xf32> to vector<8x32xf32>
    %16 = vector.extract_strided_slice %14 {offsets = [0, 32], sizes = [8, 32], strides = [1, 1]} : vector<8x128xf32> to vector<8x32xf32>
    %17 = vector.extract_strided_slice %14 {offsets = [0, 64], sizes = [8, 32], strides = [1, 1]} : vector<8x128xf32> to vector<8x32xf32>
    %cst_10 = arith.constant 2.000000e+00 : f32
    %18 = vector.broadcast %cst_10 : f32 to vector<8x32xf32>
    %19 = arith.mulf %18, %17 : vector<8x32xf32>
    %cst_11 = arith.constant 1.000000e+00 : f32
    %20 = vector.broadcast %cst_11 : f32 to vector<8x32xf32>
    %21 = arith.subf %19, %20 : vector<8x32xf32>
    %22 = vector.extract_strided_slice %14 {offsets = [0, 96], sizes = [8, 32], strides = [1, 1]} : vector<8x128xf32> to vector<8x32xf32>
    %23 = arith.mulf %16, %8 : vector<8x32xf32>
    %24 = arith.mulf %15, %21 : vector<8x32xf32>
    %25 = arith.addf %23, %24 : vector<8x32xf32>
    %26 = math.tanh %25 : vector<8x32xf32>
    %27 = arith.mulf %22, %26 : vector<8x32xf32>
    %c0_12 = arith.constant 0 : index
    %c0_13 = arith.constant 0 : index
    %28 = vector.load %arg14[%c0_12, %c0_13] : memref<64x32xf32, #tpu.memory_space<vmem>>, vector<8x32xf32>
    tpu.vector_store %arg14[%c0_12, %c0_13], %27 {strides = array<i32>} : memref<64x32xf32, #tpu.memory_space<vmem>>, vector<8x32xf32>,
    %29 = vector.extract_strided_slice %6 {offsets = [8, 0], sizes = [8, 128], strides = [1, 1]} : vector<64x128xf32> to vector<8x128xf32>
    %30 = arith.truncf %27 : vector<8x32xf32> to vector<8x32xbf16>
    %cst_14 = arith.constant dense<0.000000e+00> : vector<8x128xf32>
    %31 = tpu.matmul %30, %7, %cst_14 {dimension_numbers = #tpu.dot_dimension_numbers<[1], [0], [0], [1], [0, 0, 1, 1], [], []>} : vector<8x32xbf16>, vector<32x128xbf16>, vector<8x128xf32> -> vector<8x128xf32>
    %32 = arith.addf %29, %31 : vector<8x128xf32>
    %33 = arith.negf %32 : vector<8x128xf32>
    %34 = math.exp %33 : vector<8x128xf32>
    %cst_15 = arith.constant 1.000000e+00 : f32
    %35 = vector.broadcast %cst_15 : f32 to vector<8x128xf32>
    %36 = arith.addf %35, %34 : vector<8x128xf32>
    %37 = arith.divf %35, %36 : vector<8x128xf32>
    %38 = vector.extract_strided_slice %37 {offsets = [0, 0], sizes = [8, 32], strides = [1, 1]} : vector<8x128xf32> to vector<8x32xf32>
    %39 = vector.extract_strided_slice %37 {offsets = [0, 32], sizes = [8, 32], strides = [1, 1]} : vector<8x128xf32> to vector<8x32xf32>
    %40 = vector.extract_strided_slice %37 {offsets = [0, 64], sizes = [8, 32], strides = [1, 1]} : vector<8x128xf32> to vector<8x32xf32>
    %cst_16 = arith.constant 2.000000e+00 : f32
    %41 = vector.broadcast %cst_16 : f32 to vector<8x32xf32>
    %42 = arith.mulf %41, %40 : vector<8x32xf32>
    %cst_17 = arith.constant 1.000000e+00 : f32
    %43 = vector.broadcast %cst_17 : f32 to vector<8x32xf32>
    %44 = arith.subf %42, %43 : vector<8x32xf32>
    %45 = vector.extract_strided_slice %37 {offsets = [0, 96], sizes = [8, 32], strides = [1, 1]} : vector<8x128xf32> to vector<8x32xf32>
    %46 = arith.mulf %39, %25 : vector<8x32xf32>
    %47 = arith.mulf %38, %44 : vector<8x32xf32>
    %48 = arith.addf %46, %47 : vector<8x32xf32>
    %49 = math.tanh %48 : vector<8x32xf32>
    %50 = arith.mulf %45, %49 : vector<8x32xf32>
    %c8 = arith.constant 8 : index
    %c0_18 = arith.constant 0 : index
    %51 = vector.load %arg14[%c8, %c0_18] : memref<64x32xf32, #tpu.memory_space<vmem>>, vector<8x32xf32>
    tpu.vector_store %arg14[%c8, %c0_18], %50 {strides = array<i32>} : memref<64x32xf32, #tpu.memory_space<vmem>>, vector<8x32xf32>,
    %52 = vector.extract_strided_slice %6 {offsets = [16, 0], sizes = [8, 128], strides = [1, 1]} : vector<64x128xf32> to vector<8x128xf32>
    %53 = arith.truncf %50 : vector<8x32xf32> to vector<8x32xbf16>
    %cst_19 = arith.constant dense<0.000000e+00> : vector<8x128xf32>
    %54 = tpu.matmul %53, %7, %cst_19 {dimension_numbers = #tpu.dot_dimension_numbers<[1], [0], [0], [1], [0, 0, 1, 1], [], []>} : vector<8x32xbf16>, vector<32x128xbf16>, vector<8x128xf32> -> vector<8x128xf32>
    %55 = arith.addf %52, %54 : vector<8x128xf32>
    %56 = arith.negf %55 : vector<8x128xf32>
    %57 = math.exp %56 : vector<8x128xf32>
    %cst_20 = arith.constant 1.000000e+00 : f32
    %58 = vector.broadcast %cst_20 : f32 to vector<8x128xf32>
    %59 = arith.addf %58, %57 : vector<8x128xf32>
    %60 = arith.divf %58, %59 : vector<8x128xf32>
    %61 = vector.extract_strided_slice %60 {offsets = [0, 0], sizes = [8, 32], strides = [1, 1]} : vector<8x128xf32> to vector<8x32xf32>
    %62 = vector.extract_strided_slice %60 {offsets = [0, 32], sizes = [8, 32], strides = [1, 1]} : vector<8x128xf32> to vector<8x32xf32>
    %63 = vector.extract_strided_slice %60 {offsets = [0, 64], sizes = [8, 32], strides = [1, 1]} : vector<8x128xf32> to vector<8x32xf32>
    %cst_21 = arith.constant 2.000000e+00 : f32
    %64 = vector.broadcast %cst_21 : f32 to vector<8x32xf32>
    %65 = arith.mulf %64, %63 : vector<8x32xf32>
    %cst_22 = arith.constant 1.000000e+00 : f32
    %66 = vector.broadcast %cst_22 : f32 to vector<8x32xf32>
    %67 = arith.subf %65, %66 : vector<8x32xf32>
    %68 = vector.extract_strided_slice %60 {offsets = [0, 96], sizes = [8, 32], strides = [1, 1]} : vector<8x128xf32> to vector<8x32xf32>
    %69 = arith.mulf %62, %48 : vector<8x32xf32>
    %70 = arith.mulf %61, %67 : vector<8x32xf32>
    %71 = arith.addf %69, %70 : vector<8x32xf32>
    %72 = math.tanh %71 : vector<8x32xf32>
    %73 = arith.mulf %68, %72 : vector<8x32xf32>
    %c16 = arith.constant 16 : index
    %c0_23 = arith.constant 0 : index
    %74 = vector.load %arg14[%c16, %c0_23] : memref<64x32xf32, #tpu.memory_space<vmem>>, vector<8x32xf32>
    tpu.vector_store %arg14[%c16, %c0_23], %73 {strides = array<i32>} : memref<64x32xf32, #tpu.memory_space<vmem>>, vector<8x32xf32>,
    %75 = vector.extract_strided_slice %6 {offsets = [24, 0], sizes = [8, 128], strides = [1, 1]} : vector<64x128xf32> to vector<8x128xf32>
    %76 = arith.truncf %73 : vector<8x32xf32> to vector<8x32xbf16>
    %cst_24 = arith.constant dense<0.000000e+00> : vector<8x128xf32>
    %77 = tpu.matmul %76, %7, %cst_24 {dimension_numbers = #tpu.dot_dimension_numbers<[1], [0], [0], [1], [0, 0, 1, 1], [], []>} : vector<8x32xbf16>, vector<32x128xbf16>, vector<8x128xf32> -> vector<8x128xf32>
    %78 = arith.addf %75, %77 : vector<8x128xf32>
    %79 = arith.negf %78 : vector<8x128xf32>
    %80 = math.exp %79 : vector<8x128xf32>
    %cst_25 = arith.constant 1.000000e+00 : f32
    %81 = vector.broadcast %cst_25 : f32 to vector<8x128xf32>
    %82 = arith.addf %81, %80 : vector<8x128xf32>
    %83 = arith.divf %81, %82 : vector<8x128xf32>
    %84 = vector.extract_strided_slice %83 {offsets = [0, 0], sizes = [8, 32], strides = [1, 1]} : vector<8x128xf32> to vector<8x32xf32>
    %85 = vector.extract_strided_slice %83 {offsets = [0, 32], sizes = [8, 32], strides = [1, 1]} : vector<8x128xf32> to vector<8x32xf32>
    %86 = vector.extract_strided_slice %83 {offsets = [0, 64], sizes = [8, 32], strides = [1, 1]} : vector<8x128xf32> to vector<8x32xf32>
    %cst_26 = arith.constant 2.000000e+00 : f32
    %87 = vector.broadcast %cst_26 : f32 to vector<8x32xf32>
    %88 = arith.mulf %87, %86 : vector<8x32xf32>
    %cst_27 = arith.constant 1.000000e+00 : f32
    %89 = vector.broadcast %cst_27 : f32 to vector<8x32xf32>
    %90 = arith.subf %88, %89 : vector<8x32xf32>
    %91 = vector.extract_strided_slice %83 {offsets = [0, 96], sizes = [8, 32], strides = [1, 1]} : vector<8x128xf32> to vector<8x32xf32>
    %92 = arith.mulf %85, %71 : vector<8x32xf32>
    %93 = arith.mulf %84, %90 : vector<8x32xf32>
    %94 = arith.addf %92, %93 : vector<8x32xf32>
    %95 = math.tanh %94 : vector<8x32xf32>
    %96 = arith.mulf %91, %95 : vector<8x32xf32>
    %c24 = arith.constant 24 : index
    %c0_28 = arith.constant 0 : index
    %97 = vector.load %arg14[%c24, %c0_28] : memref<64x32xf32, #tpu.memory_space<vmem>>, vector<8x32xf32>
    tpu.vector_store %arg14[%c24, %c0_28], %96 {strides = array<i32>} : memref<64x32xf32, #tpu.memory_space<vmem>>, vector<8x32xf32>,
    %98 = vector.extract_strided_slice %6 {offsets = [32, 0], sizes = [8, 128], strides = [1, 1]} : vector<64x128xf32> to vector<8x128xf32>
    %99 = arith.truncf %96 : vector<8x32xf32> to vector<8x32xbf16>
    %cst_29 = arith.constant dense<0.000000e+00> : vector<8x128xf32>
    %100 = tpu.matmul %99, %7, %cst_29 {dimension_numbers = #tpu.dot_dimension_numbers<[1], [0], [0], [1], [0, 0, 1, 1], [], []>} : vector<8x32xbf16>, vector<32x128xbf16>, vector<8x128xf32> -> vector<8x128xf32>
    %101 = arith.addf %98, %100 : vector<8x128xf32>
    %102 = arith.negf %101 : vector<8x128xf32>
    %103 = math.exp %102 : vector<8x128xf32>
    %cst_30 = arith.constant 1.000000e+00 : f32
    %104 = vector.broadcast %cst_30 : f32 to vector<8x128xf32>
    %105 = arith.addf %104, %103 : vector<8x128xf32>
    %106 = arith.divf %104, %105 : vector<8x128xf32>
    %107 = vector.extract_strided_slice %106 {offsets = [0, 0], sizes = [8, 32], strides = [1, 1]} : vector<8x128xf32> to vector<8x32xf32>
    %108 = vector.extract_strided_slice %106 {offsets = [0, 32], sizes = [8, 32], strides = [1, 1]} : vector<8x128xf32> to vector<8x32xf32>
    %109 = vector.extract_strided_slice %106 {offsets = [0, 64], sizes = [8, 32], strides = [1, 1]} : vector<8x128xf32> to vector<8x32xf32>
    %cst_31 = arith.constant 2.000000e+00 : f32
    %110 = vector.broadcast %cst_31 : f32 to vector<8x32xf32>
    %111 = arith.mulf %110, %109 : vector<8x32xf32>
    %cst_32 = arith.constant 1.000000e+00 : f32
    %112 = vector.broadcast %cst_32 : f32 to vector<8x32xf32>
    %113 = arith.subf %111, %112 : vector<8x32xf32>
    %114 = vector.extract_strided_slice %106 {offsets = [0, 96], sizes = [8, 32], strides = [1, 1]} : vector<8x128xf32> to vector<8x32xf32>
    %115 = arith.mulf %108, %94 : vector<8x32xf32>
    %116 = arith.mulf %107, %113 : vector<8x32xf32>
    %117 = arith.addf %115, %116 : vector<8x32xf32>
    %118 = math.tanh %117 : vector<8x32xf32>
    %119 = arith.mulf %114, %118 : vector<8x32xf32>
    %c32 = arith.constant 32 : index
    %c0_33 = arith.constant 0 : index
    %120 = vector.load %arg14[%c32, %c0_33] : memref<64x32xf32, #tpu.memory_space<vmem>>, vector<8x32xf32>
    tpu.vector_store %arg14[%c32, %c0_33], %119 {strides = array<i32>} : memref<64x32xf32, #tpu.memory_space<vmem>>, vector<8x32xf32>,
    %121 = vector.extract_strided_slice %6 {offsets = [40, 0], sizes = [8, 128], strides = [1, 1]} : vector<64x128xf32> to vector<8x128xf32>
    %122 = arith.truncf %119 : vector<8x32xf32> to vector<8x32xbf16>
    %cst_34 = arith.constant dense<0.000000e+00> : vector<8x128xf32>
    %123 = tpu.matmul %122, %7, %cst_34 {dimension_numbers = #tpu.dot_dimension_numbers<[1], [0], [0], [1], [0, 0, 1, 1], [], []>} : vector<8x32xbf16>, vector<32x128xbf16>, vector<8x128xf32> -> vector<8x128xf32>
    %124 = arith.addf %121, %123 : vector<8x128xf32>
    %125 = arith.negf %124 : vector<8x128xf32>
    %126 = math.exp %125 : vector<8x128xf32>
    %cst_35 = arith.constant 1.000000e+00 : f32
    %127 = vector.broadcast %cst_35 : f32 to vector<8x128xf32>
    %128 = arith.addf %127, %126 : vector<8x128xf32>
    %129 = arith.divf %127, %128 : vector<8x128xf32>
    %130 = vector.extract_strided_slice %129 {offsets = [0, 0], sizes = [8, 32], strides = [1, 1]} : vector<8x128xf32> to vector<8x32xf32>
    %131 = vector.extract_strided_slice %129 {offsets = [0, 32], sizes = [8, 32], strides = [1, 1]} : vector<8x128xf32> to vector<8x32xf32>
    %132 = vector.extract_strided_slice %129 {offsets = [0, 64], sizes = [8, 32], strides = [1, 1]} : vector<8x128xf32> to vector<8x32xf32>
    %cst_36 = arith.constant 2.000000e+00 : f32
    %133 = vector.broadcast %cst_36 : f32 to vector<8x32xf32>
    %134 = arith.mulf %133, %132 : vector<8x32xf32>
    %cst_37 = arith.constant 1.000000e+00 : f32
    %135 = vector.broadcast %cst_37 : f32 to vector<8x32xf32>
    %136 = arith.subf %134, %135 : vector<8x32xf32>
    %137 = vector.extract_strided_slice %129 {offsets = [0, 96], sizes = [8, 32], strides = [1, 1]} : vector<8x128xf32> to vector<8x32xf32>
    %138 = arith.mulf %131, %117 : vector<8x32xf32>
    %139 = arith.mulf %130, %136 : vector<8x32xf32>
    %140 = arith.addf %138, %139 : vector<8x32xf32>
    %141 = math.tanh %140 : vector<8x32xf32>
    %142 = arith.mulf %137, %141 : vector<8x32xf32>
    %c40 = arith.constant 40 : index
    %c0_38 = arith.constant 0 : index
    %143 = vector.load %arg14[%c40, %c0_38] : memref<64x32xf32, #tpu.memory_space<vmem>>, vector<8x32xf32>
    tpu.vector_store %arg14[%c40, %c0_38], %142 {strides = array<i32>} : memref<64x32xf32, #tpu.memory_space<vmem>>, vector<8x32xf32>,
    %144 = vector.extract_strided_slice %6 {offsets = [48, 0], sizes = [8, 128], strides = [1, 1]} : vector<64x128xf32> to vector<8x128xf32>
    %145 = arith.truncf %142 : vector<8x32xf32> to vector<8x32xbf16>
    %cst_39 = arith.constant dense<0.000000e+00> : vector<8x128xf32>
    %146 = tpu.matmul %145, %7, %cst_39 {dimension_numbers = #tpu.dot_dimension_numbers<[1], [0], [0], [1], [0, 0, 1, 1], [], []>} : vector<8x32xbf16>, vector<32x128xbf16>, vector<8x128xf32> -> vector<8x128xf32>
    %147 = arith.addf %144, %146 : vector<8x128xf32>
    %148 = arith.negf %147 : vector<8x128xf32>
    %149 = math.exp %148 : vector<8x128xf32>
    %cst_40 = arith.constant 1.000000e+00 : f32
    %150 = vector.broadcast %cst_40 : f32 to vector<8x128xf32>
    %151 = arith.addf %150, %149 : vector<8x128xf32>
    %152 = arith.divf %150, %151 : vector<8x128xf32>
    %153 = vector.extract_strided_slice %152 {offsets = [0, 0], sizes = [8, 32], strides = [1, 1]} : vector<8x128xf32> to vector<8x32xf32>
    %154 = vector.extract_strided_slice %152 {offsets = [0, 32], sizes = [8, 32], strides = [1, 1]} : vector<8x128xf32> to vector<8x32xf32>
    %155 = vector.extract_strided_slice %152 {offsets = [0, 64], sizes = [8, 32], strides = [1, 1]} : vector<8x128xf32> to vector<8x32xf32>
    %cst_41 = arith.constant 2.000000e+00 : f32
    %156 = vector.broadcast %cst_41 : f32 to vector<8x32xf32>
    %157 = arith.mulf %156, %155 : vector<8x32xf32>
    %cst_42 = arith.constant 1.000000e+00 : f32
    %158 = vector.broadcast %cst_42 : f32 to vector<8x32xf32>
    %159 = arith.subf %157, %158 : vector<8x32xf32>
    %160 = vector.extract_strided_slice %152 {offsets = [0, 96], sizes = [8, 32], strides = [1, 1]} : vector<8x128xf32> to vector<8x32xf32>
    %161 = arith.mulf %154, %140 : vector<8x32xf32>
    %162 = arith.mulf %153, %159 : vector<8x32xf32>
    %163 = arith.addf %161, %162 : vector<8x32xf32>
    %164 = math.tanh %163 : vector<8x32xf32>
    %165 = arith.mulf %160, %164 : vector<8x32xf32>
    %c48 = arith.constant 48 : index
    %c0_43 = arith.constant 0 : index
    %166 = vector.load %arg14[%c48, %c0_43] : memref<64x32xf32, #tpu.memory_space<vmem>>, vector<8x32xf32>
    tpu.vector_store %arg14[%c48, %c0_43], %165 {strides = array<i32>} : memref<64x32xf32, #tpu.memory_space<vmem>>, vector<8x32xf32>,
    %167 = vector.extract_strided_slice %6 {offsets = [56, 0], sizes = [8, 128], strides = [1, 1]} : vector<64x128xf32> to vector<8x128xf32>
    %168 = arith.truncf %165 : vector<8x32xf32> to vector<8x32xbf16>
    %cst_44 = arith.constant dense<0.000000e+00> : vector<8x128xf32>
    %169 = tpu.matmul %168, %7, %cst_44 {dimension_numbers = #tpu.dot_dimension_numbers<[1], [0], [0], [1], [0, 0, 1, 1], [], []>} : vector<8x32xbf16>, vector<32x128xbf16>, vector<8x128xf32> -> vector<8x128xf32>
    %170 = arith.addf %167, %169 : vector<8x128xf32>
    %171 = arith.negf %170 : vector<8x128xf32>
    %172 = math.exp %171 : vector<8x128xf32>
    %cst_45 = arith.constant 1.000000e+00 : f32
    %173 = vector.broadcast %cst_45 : f32 to vector<8x128xf32>
    %174 = arith.addf %173, %172 : vector<8x128xf32>
    %175 = arith.divf %173, %174 : vector<8x128xf32>
    %176 = vector.extract_strided_slice %175 {offsets = [0, 0], sizes = [8, 32], strides = [1, 1]} : vector<8x128xf32> to vector<8x32xf32>
    %177 = vector.extract_strided_slice %175 {offsets = [0, 32], sizes = [8, 32], strides = [1, 1]} : vector<8x128xf32> to vector<8x32xf32>
    %178 = vector.extract_strided_slice %175 {offsets = [0, 64], sizes = [8, 32], strides = [1, 1]} : vector<8x128xf32> to vector<8x32xf32>
    %cst_46 = arith.constant 2.000000e+00 : f32
    %179 = vector.broadcast %cst_46 : f32 to vector<8x32xf32>
    %180 = arith.mulf %179, %178 : vector<8x32xf32>
    %cst_47 = arith.constant 1.000000e+00 : f32
    %181 = vector.broadcast %cst_47 : f32 to vector<8x32xf32>
    %182 = arith.subf %180, %181 : vector<8x32xf32>
    %183 = vector.extract_strided_slice %175 {offsets = [0, 96], sizes = [8, 32], strides = [1, 1]} : vector<8x128xf32> to vector<8x32xf32>
    %184 = arith.mulf %177, %163 : vector<8x32xf32>
    %185 = arith.mulf %176, %182 : vector<8x32xf32>
    %186 = arith.addf %184, %185 : vector<8x32xf32>
    %187 = math.tanh %186 : vector<8x32xf32>
    %188 = arith.mulf %183, %187 : vector<8x32xf32>
    %c56 = arith.constant 56 : index
    %c0_48 = arith.constant 0 : index
    %189 = vector.load %arg14[%c56, %c0_48] : memref<64x32xf32, #tpu.memory_space<vmem>>, vector<8x32xf32>
    tpu.vector_store %arg14[%c56, %c0_48], %188 {strides = array<i32>} : memref<64x32xf32, #tpu.memory_space<vmem>>, vector<8x32xf32>,
    %c0_49 = arith.constant 0 : index
    %c0_50 = arith.constant 0 : index
    %190 = vector.load %arg14[%c0_49, %c0_50] : memref<64x32xf32, #tpu.memory_space<vmem>>, vector<64x32xf32>
    %191 = arith.truncf %190 : vector<64x32xf32> to vector<64x32xbf16>
    %c0_51 = arith.constant 0 : index
    %c0_52 = arith.constant 0 : index
    %192 = vector.load %arg5[%c0_51, %c0_52] : memref<32x128xbf16, #tpu.memory_space<vmem>>, vector<32x128xbf16>
    %cst_53 = arith.constant dense<0.000000e+00> : vector<64x128xf32>
    %193 = tpu.matmul %191, %192, %cst_53 {dimension_numbers = #tpu.dot_dimension_numbers<[1], [0], [0], [1], [0, 0, 1, 1], [], []>} : vector<64x32xbf16>, vector<32x128xbf16>, vector<64x128xf32> -> vector<64x128xf32>
    %c0_54 = arith.constant 0 : index
    %c0_55 = arith.constant 0 : index
    %194 = vector.load %arg7[%c0_54, %c0_55] : memref<1x128xf32, #tpu.memory_space<vmem>>, vector<1x128xf32>
    %195 = vector.broadcast %194 : vector<1x128xf32> to vector<64x128xf32>
    %196 = arith.addf %193, %195 : vector<64x128xf32>
    %c0_56 = arith.constant 0 : index
    %c0_57 = arith.constant 0 : index
    %197 = vector.load %arg6[%c0_56, %c0_57] : memref<32x128xbf16, #tpu.memory_space<vmem>>, vector<32x128xbf16>
    %cst_58 = arith.constant 0.000000e+00 : f32
    %198 = vector.broadcast %cst_58 : f32 to vector<8x32xf32>
    %199 = vector.extract_strided_slice %196 {offsets = [0, 0], sizes = [8, 128], strides = [1, 1]} : vector<64x128xf32> to vector<8x128xf32>
    %200 = arith.negf %199 : vector<8x128xf32>
    %201 = math.exp %200 : vector<8x128xf32>
    %cst_59 = arith.constant 1.000000e+00 : f32
    %202 = vector.broadcast %cst_59 : f32 to vector<8x128xf32>
    %203 = arith.addf %202, %201 : vector<8x128xf32>
    %204 = arith.divf %202, %203 : vector<8x128xf32>
    %205 = vector.extract_strided_slice %204 {offsets = [0, 0], sizes = [8, 32], strides = [1, 1]} : vector<8x128xf32> to vector<8x32xf32>
    %206 = vector.extract_strided_slice %204 {offsets = [0, 32], sizes = [8, 32], strides = [1, 1]} : vector<8x128xf32> to vector<8x32xf32>
    %207 = vector.extract_strided_slice %204 {offsets = [0, 64], sizes = [8, 32], strides = [1, 1]} : vector<8x128xf32> to vector<8x32xf32>
    %cst_60 = arith.constant 2.000000e+00 : f32
    %208 = vector.broadcast %cst_60 : f32 to vector<8x32xf32>
    %209 = arith.mulf %208, %207 : vector<8x32xf32>
    %cst_61 = arith.constant 1.000000e+00 : f32
    %210 = vector.broadcast %cst_61 : f32 to vector<8x32xf32>
    %211 = arith.subf %209, %210 : vector<8x32xf32>
    %212 = vector.extract_strided_slice %204 {offsets = [0, 96], sizes = [8, 32], strides = [1, 1]} : vector<8x128xf32> to vector<8x32xf32>
    %213 = arith.mulf %206, %198 : vector<8x32xf32>
    %214 = arith.mulf %205, %211 : vector<8x32xf32>
    %215 = arith.addf %213, %214 : vector<8x32xf32>
    %216 = math.tanh %215 : vector<8x32xf32>
    %217 = arith.mulf %212, %216 : vector<8x32xf32>
    %c0_62 = arith.constant 0 : index
    %c0_63 = arith.constant 0 : index
    %218 = vector.load %arg14[%c0_62, %c0_63] : memref<64x32xf32, #tpu.memory_space<vmem>>, vector<8x32xf32>
    tpu.vector_store %arg14[%c0_62, %c0_63], %217 {strides = array<i32>} : memref<64x32xf32, #tpu.memory_space<vmem>>, vector<8x32xf32>,
    %219 = vector.extract_strided_slice %196 {offsets = [8, 0], sizes = [8, 128], strides = [1, 1]} : vector<64x128xf32> to vector<8x128xf32>
    %220 = arith.truncf %217 : vector<8x32xf32> to vector<8x32xbf16>
    %cst_64 = arith.constant dense<0.000000e+00> : vector<8x128xf32>
    %221 = tpu.matmul %220, %197, %cst_64 {dimension_numbers = #tpu.dot_dimension_numbers<[1], [0], [0], [1], [0, 0, 1, 1], [], []>} : vector<8x32xbf16>, vector<32x128xbf16>, vector<8x128xf32> -> vector<8x128xf32>
    %222 = arith.addf %219, %221 : vector<8x128xf32>
    %223 = arith.negf %222 : vector<8x128xf32>
    %224 = math.exp %223 : vector<8x128xf32>
    %cst_65 = arith.constant 1.000000e+00 : f32
    %225 = vector.broadcast %cst_65 : f32 to vector<8x128xf32>
    %226 = arith.addf %225, %224 : vector<8x128xf32>
    %227 = arith.divf %225, %226 : vector<8x128xf32>
    %228 = vector.extract_strided_slice %227 {offsets = [0, 0], sizes = [8, 32], strides = [1, 1]} : vector<8x128xf32> to vector<8x32xf32>
    %229 = vector.extract_strided_slice %227 {offsets = [0, 32], sizes = [8, 32], strides = [1, 1]} : vector<8x128xf32> to vector<8x32xf32>
    %230 = vector.extract_strided_slice %227 {offsets = [0, 64], sizes = [8, 32], strides = [1, 1]} : vector<8x128xf32> to vector<8x32xf32>
    %cst_66 = arith.constant 2.000000e+00 : f32
    %231 = vector.broadcast %cst_66 : f32 to vector<8x32xf32>
    %232 = arith.mulf %231, %230 : vector<8x32xf32>
    %cst_67 = arith.constant 1.000000e+00 : f32
    %233 = vector.broadcast %cst_67 : f32 to vector<8x32xf32>
    %234 = arith.subf %232, %233 : vector<8x32xf32>
    %235 = vector.extract_strided_slice %227 {offsets = [0, 96], sizes = [8, 32], strides = [1, 1]} : vector<8x128xf32> to vector<8x32xf32>
    %236 = arith.mulf %229, %215 : vector<8x32xf32>
    %237 = arith.mulf %228, %234 : vector<8x32xf32>
    %238 = arith.addf %236, %237 : vector<8x32xf32>
    %239 = math.tanh %238 : vector<8x32xf32>
    %240 = arith.mulf %235, %239 : vector<8x32xf32>
    %c8_68 = arith.constant 8 : index
    %c0_69 = arith.constant 0 : index
    %241 = vector.load %arg14[%c8_68, %c0_69] : memref<64x32xf32, #tpu.memory_space<vmem>>, vector<8x32xf32>
    tpu.vector_store %arg14[%c8_68, %c0_69], %240 {strides = array<i32>} : memref<64x32xf32, #tpu.memory_space<vmem>>, vector<8x32xf32>,
    %242 = vector.extract_strided_slice %196 {offsets = [16, 0], sizes = [8, 128], strides = [1, 1]} : vector<64x128xf32> to vector<8x128xf32>
    %243 = arith.truncf %240 : vector<8x32xf32> to vector<8x32xbf16>
    %cst_70 = arith.constant dense<0.000000e+00> : vector<8x128xf32>
    %244 = tpu.matmul %243, %197, %cst_70 {dimension_numbers = #tpu.dot_dimension_numbers<[1], [0], [0], [1], [0, 0, 1, 1], [], []>} : vector<8x32xbf16>, vector<32x128xbf16>, vector<8x128xf32> -> vector<8x128xf32>
    %245 = arith.addf %242, %244 : vector<8x128xf32>
    %246 = arith.negf %245 : vector<8x128xf32>
    %247 = math.exp %246 : vector<8x128xf32>
    %cst_71 = arith.constant 1.000000e+00 : f32
    %248 = vector.broadcast %cst_71 : f32 to vector<8x128xf32>
    %249 = arith.addf %248, %247 : vector<8x128xf32>
    %250 = arith.divf %248, %249 : vector<8x128xf32>
    %251 = vector.extract_strided_slice %250 {offsets = [0, 0], sizes = [8, 32], strides = [1, 1]} : vector<8x128xf32> to vector<8x32xf32>
    %252 = vector.extract_strided_slice %250 {offsets = [0, 32], sizes = [8, 32], strides = [1, 1]} : vector<8x128xf32> to vector<8x32xf32>
    %253 = vector.extract_strided_slice %250 {offsets = [0, 64], sizes = [8, 32], strides = [1, 1]} : vector<8x128xf32> to vector<8x32xf32>
    %cst_72 = arith.constant 2.000000e+00 : f32
    %254 = vector.broadcast %cst_72 : f32 to vector<8x32xf32>
    %255 = arith.mulf %254, %253 : vector<8x32xf32>
    %cst_73 = arith.constant 1.000000e+00 : f32
    %256 = vector.broadcast %cst_73 : f32 to vector<8x32xf32>
    %257 = arith.subf %255, %256 : vector<8x32xf32>
    %258 = vector.extract_strided_slice %250 {offsets = [0, 96], sizes = [8, 32], strides = [1, 1]} : vector<8x128xf32> to vector<8x32xf32>
    %259 = arith.mulf %252, %238 : vector<8x32xf32>
    %260 = arith.mulf %251, %257 : vector<8x32xf32>
    %261 = arith.addf %259, %260 : vector<8x32xf32>
    %262 = math.tanh %261 : vector<8x32xf32>
    %263 = arith.mulf %258, %262 : vector<8x32xf32>
    %c16_74 = arith.constant 16 : index
    %c0_75 = arith.constant 0 : index
    %264 = vector.load %arg14[%c16_74, %c0_75] : memref<64x32xf32, #tpu.memory_space<vmem>>, vector<8x32xf32>
    tpu.vector_store %arg14[%c16_74, %c0_75], %263 {strides = array<i32>} : memref<64x32xf32, #tpu.memory_space<vmem>>, vector<8x32xf32>,
    %265 = vector.extract_strided_slice %196 {offsets = [24, 0], sizes = [8, 128], strides = [1, 1]} : vector<64x128xf32> to vector<8x128xf32>
    %266 = arith.truncf %263 : vector<8x32xf32> to vector<8x32xbf16>
    %cst_76 = arith.constant dense<0.000000e+00> : vector<8x128xf32>
    %267 = tpu.matmul %266, %197, %cst_76 {dimension_numbers = #tpu.dot_dimension_numbers<[1], [0], [0], [1], [0, 0, 1, 1], [], []>} : vector<8x32xbf16>, vector<32x128xbf16>, vector<8x128xf32> -> vector<8x128xf32>
    %268 = arith.addf %265, %267 : vector<8x128xf32>
    %269 = arith.negf %268 : vector<8x128xf32>
    %270 = math.exp %269 : vector<8x128xf32>
    %cst_77 = arith.constant 1.000000e+00 : f32
    %271 = vector.broadcast %cst_77 : f32 to vector<8x128xf32>
    %272 = arith.addf %271, %270 : vector<8x128xf32>
    %273 = arith.divf %271, %272 : vector<8x128xf32>
    %274 = vector.extract_strided_slice %273 {offsets = [0, 0], sizes = [8, 32], strides = [1, 1]} : vector<8x128xf32> to vector<8x32xf32>
    %275 = vector.extract_strided_slice %273 {offsets = [0, 32], sizes = [8, 32], strides = [1, 1]} : vector<8x128xf32> to vector<8x32xf32>
    %276 = vector.extract_strided_slice %273 {offsets = [0, 64], sizes = [8, 32], strides = [1, 1]} : vector<8x128xf32> to vector<8x32xf32>
    %cst_78 = arith.constant 2.000000e+00 : f32
    %277 = vector.broadcast %cst_78 : f32 to vector<8x32xf32>
    %278 = arith.mulf %277, %276 : vector<8x32xf32>
    %cst_79 = arith.constant 1.000000e+00 : f32
    %279 = vector.broadcast %cst_79 : f32 to vector<8x32xf32>
    %280 = arith.subf %278, %279 : vector<8x32xf32>
    %281 = vector.extract_strided_slice %273 {offsets = [0, 96], sizes = [8, 32], strides = [1, 1]} : vector<8x128xf32> to vector<8x32xf32>
    %282 = arith.mulf %275, %261 : vector<8x32xf32>
    %283 = arith.mulf %274, %280 : vector<8x32xf32>
    %284 = arith.addf %282, %283 : vector<8x32xf32>
    %285 = math.tanh %284 : vector<8x32xf32>
    %286 = arith.mulf %281, %285 : vector<8x32xf32>
    %c24_80 = arith.constant 24 : index
    %c0_81 = arith.constant 0 : index
    %287 = vector.load %arg14[%c24_80, %c0_81] : memref<64x32xf32, #tpu.memory_space<vmem>>, vector<8x32xf32>
    tpu.vector_store %arg14[%c24_80, %c0_81], %286 {strides = array<i32>} : memref<64x32xf32, #tpu.memory_space<vmem>>, vector<8x32xf32>,
    %288 = vector.extract_strided_slice %196 {offsets = [32, 0], sizes = [8, 128], strides = [1, 1]} : vector<64x128xf32> to vector<8x128xf32>
    %289 = arith.truncf %286 : vector<8x32xf32> to vector<8x32xbf16>
    %cst_82 = arith.constant dense<0.000000e+00> : vector<8x128xf32>
    %290 = tpu.matmul %289, %197, %cst_82 {dimension_numbers = #tpu.dot_dimension_numbers<[1], [0], [0], [1], [0, 0, 1, 1], [], []>} : vector<8x32xbf16>, vector<32x128xbf16>, vector<8x128xf32> -> vector<8x128xf32>
    %291 = arith.addf %288, %290 : vector<8x128xf32>
    %292 = arith.negf %291 : vector<8x128xf32>
    %293 = math.exp %292 : vector<8x128xf32>
    %cst_83 = arith.constant 1.000000e+00 : f32
    %294 = vector.broadcast %cst_83 : f32 to vector<8x128xf32>
    %295 = arith.addf %294, %293 : vector<8x128xf32>
    %296 = arith.divf %294, %295 : vector<8x128xf32>
    %297 = vector.extract_strided_slice %296 {offsets = [0, 0], sizes = [8, 32], strides = [1, 1]} : vector<8x128xf32> to vector<8x32xf32>
    %298 = vector.extract_strided_slice %296 {offsets = [0, 32], sizes = [8, 32], strides = [1, 1]} : vector<8x128xf32> to vector<8x32xf32>
    %299 = vector.extract_strided_slice %296 {offsets = [0, 64], sizes = [8, 32], strides = [1, 1]} : vector<8x128xf32> to vector<8x32xf32>
    %cst_84 = arith.constant 2.000000e+00 : f32
    %300 = vector.broadcast %cst_84 : f32 to vector<8x32xf32>
    %301 = arith.mulf %300, %299 : vector<8x32xf32>
    %cst_85 = arith.constant 1.000000e+00 : f32
    %302 = vector.broadcast %cst_85 : f32 to vector<8x32xf32>
    %303 = arith.subf %301, %302 : vector<8x32xf32>
    %304 = vector.extract_strided_slice %296 {offsets = [0, 96], sizes = [8, 32], strides = [1, 1]} : vector<8x128xf32> to vector<8x32xf32>
    %305 = arith.mulf %298, %284 : vector<8x32xf32>
    %306 = arith.mulf %297, %303 : vector<8x32xf32>
    %307 = arith.addf %305, %306 : vector<8x32xf32>
    %308 = math.tanh %307 : vector<8x32xf32>
    %309 = arith.mulf %304, %308 : vector<8x32xf32>
    %c32_86 = arith.constant 32 : index
    %c0_87 = arith.constant 0 : index
    %310 = vector.load %arg14[%c32_86, %c0_87] : memref<64x32xf32, #tpu.memory_space<vmem>>, vector<8x32xf32>
    tpu.vector_store %arg14[%c32_86, %c0_87], %309 {strides = array<i32>} : memref<64x32xf32, #tpu.memory_space<vmem>>, vector<8x32xf32>,
    %311 = vector.extract_strided_slice %196 {offsets = [40, 0], sizes = [8, 128], strides = [1, 1]} : vector<64x128xf32> to vector<8x128xf32>
    %312 = arith.truncf %309 : vector<8x32xf32> to vector<8x32xbf16>
    %cst_88 = arith.constant dense<0.000000e+00> : vector<8x128xf32>
    %313 = tpu.matmul %312, %197, %cst_88 {dimension_numbers = #tpu.dot_dimension_numbers<[1], [0], [0], [1], [0, 0, 1, 1], [], []>} : vector<8x32xbf16>, vector<32x128xbf16>, vector<8x128xf32> -> vector<8x128xf32>
    %314 = arith.addf %311, %313 : vector<8x128xf32>
    %315 = arith.negf %314 : vector<8x128xf32>
    %316 = math.exp %315 : vector<8x128xf32>
    %cst_89 = arith.constant 1.000000e+00 : f32
    %317 = vector.broadcast %cst_89 : f32 to vector<8x128xf32>
    %318 = arith.addf %317, %316 : vector<8x128xf32>
    %319 = arith.divf %317, %318 : vector<8x128xf32>
    %320 = vector.extract_strided_slice %319 {offsets = [0, 0], sizes = [8, 32], strides = [1, 1]} : vector<8x128xf32> to vector<8x32xf32>
    %321 = vector.extract_strided_slice %319 {offsets = [0, 32], sizes = [8, 32], strides = [1, 1]} : vector<8x128xf32> to vector<8x32xf32>
    %322 = vector.extract_strided_slice %319 {offsets = [0, 64], sizes = [8, 32], strides = [1, 1]} : vector<8x128xf32> to vector<8x32xf32>
    %cst_90 = arith.constant 2.000000e+00 : f32
    %323 = vector.broadcast %cst_90 : f32 to vector<8x32xf32>
    %324 = arith.mulf %323, %322 : vector<8x32xf32>
    %cst_91 = arith.constant 1.000000e+00 : f32
    %325 = vector.broadcast %cst_91 : f32 to vector<8x32xf32>
    %326 = arith.subf %324, %325 : vector<8x32xf32>
    %327 = vector.extract_strided_slice %319 {offsets = [0, 96], sizes = [8, 32], strides = [1, 1]} : vector<8x128xf32> to vector<8x32xf32>
    %328 = arith.mulf %321, %307 : vector<8x32xf32>
    %329 = arith.mulf %320, %326 : vector<8x32xf32>
    %330 = arith.addf %328, %329 : vector<8x32xf32>
    %331 = math.tanh %330 : vector<8x32xf32>
    %332 = arith.mulf %327, %331 : vector<8x32xf32>
    %c40_92 = arith.constant 40 : index
    %c0_93 = arith.constant 0 : index
    %333 = vector.load %arg14[%c40_92, %c0_93] : memref<64x32xf32, #tpu.memory_space<vmem>>, vector<8x32xf32>
    tpu.vector_store %arg14[%c40_92, %c0_93], %332 {strides = array<i32>} : memref<64x32xf32, #tpu.memory_space<vmem>>, vector<8x32xf32>,
    %334 = vector.extract_strided_slice %196 {offsets = [48, 0], sizes = [8, 128], strides = [1, 1]} : vector<64x128xf32> to vector<8x128xf32>
    %335 = arith.truncf %332 : vector<8x32xf32> to vector<8x32xbf16>
    %cst_94 = arith.constant dense<0.000000e+00> : vector<8x128xf32>
    %336 = tpu.matmul %335, %197, %cst_94 {dimension_numbers = #tpu.dot_dimension_numbers<[1], [0], [0], [1], [0, 0, 1, 1], [], []>} : vector<8x32xbf16>, vector<32x128xbf16>, vector<8x128xf32> -> vector<8x128xf32>
    %337 = arith.addf %334, %336 : vector<8x128xf32>
    %338 = arith.negf %337 : vector<8x128xf32>
    %339 = math.exp %338 : vector<8x128xf32>
    %cst_95 = arith.constant 1.000000e+00 : f32
    %340 = vector.broadcast %cst_95 : f32 to vector<8x128xf32>
    %341 = arith.addf %340, %339 : vector<8x128xf32>
    %342 = arith.divf %340, %341 : vector<8x128xf32>
    %343 = vector.extract_strided_slice %342 {offsets = [0, 0], sizes = [8, 32], strides = [1, 1]} : vector<8x128xf32> to vector<8x32xf32>
    %344 = vector.extract_strided_slice %342 {offsets = [0, 32], sizes = [8, 32], strides = [1, 1]} : vector<8x128xf32> to vector<8x32xf32>
    %345 = vector.extract_strided_slice %342 {offsets = [0, 64], sizes = [8, 32], strides = [1, 1]} : vector<8x128xf32> to vector<8x32xf32>
    %cst_96 = arith.constant 2.000000e+00 : f32
    %346 = vector.broadcast %cst_96 : f32 to vector<8x32xf32>
    %347 = arith.mulf %346, %345 : vector<8x32xf32>
    %cst_97 = arith.constant 1.000000e+00 : f32
    %348 = vector.broadcast %cst_97 : f32 to vector<8x32xf32>
    %349 = arith.subf %347, %348 : vector<8x32xf32>
    %350 = vector.extract_strided_slice %342 {offsets = [0, 96], sizes = [8, 32], strides = [1, 1]} : vector<8x128xf32> to vector<8x32xf32>
    %351 = arith.mulf %344, %330 : vector<8x32xf32>
    %352 = arith.mulf %343, %349 : vector<8x32xf32>
    %353 = arith.addf %351, %352 : vector<8x32xf32>
    %354 = math.tanh %353 : vector<8x32xf32>
    %355 = arith.mulf %350, %354 : vector<8x32xf32>
    %c48_98 = arith.constant 48 : index
    %c0_99 = arith.constant 0 : index
    %356 = vector.load %arg14[%c48_98, %c0_99] : memref<64x32xf32, #tpu.memory_space<vmem>>, vector<8x32xf32>
    tpu.vector_store %arg14[%c48_98, %c0_99], %355 {strides = array<i32>} : memref<64x32xf32, #tpu.memory_space<vmem>>, vector<8x32xf32>,
    %357 = vector.extract_strided_slice %196 {offsets = [56, 0], sizes = [8, 128], strides = [1, 1]} : vector<64x128xf32> to vector<8x128xf32>
    %358 = arith.truncf %355 : vector<8x32xf32> to vector<8x32xbf16>
    %cst_100 = arith.constant dense<0.000000e+00> : vector<8x128xf32>
    %359 = tpu.matmul %358, %197, %cst_100 {dimension_numbers = #tpu.dot_dimension_numbers<[1], [0], [0], [1], [0, 0, 1, 1], [], []>} : vector<8x32xbf16>, vector<32x128xbf16>, vector<8x128xf32> -> vector<8x128xf32>
    %360 = arith.addf %357, %359 : vector<8x128xf32>
    %361 = arith.negf %360 : vector<8x128xf32>
    %362 = math.exp %361 : vector<8x128xf32>
    %cst_101 = arith.constant 1.000000e+00 : f32
    %363 = vector.broadcast %cst_101 : f32 to vector<8x128xf32>
    %364 = arith.addf %363, %362 : vector<8x128xf32>
    %365 = arith.divf %363, %364 : vector<8x128xf32>
    %366 = vector.extract_strided_slice %365 {offsets = [0, 0], sizes = [8, 32], strides = [1, 1]} : vector<8x128xf32> to vector<8x32xf32>
    %367 = vector.extract_strided_slice %365 {offsets = [0, 32], sizes = [8, 32], strides = [1, 1]} : vector<8x128xf32> to vector<8x32xf32>
    %368 = vector.extract_strided_slice %365 {offsets = [0, 64], sizes = [8, 32], strides = [1, 1]} : vector<8x128xf32> to vector<8x32xf32>
    %cst_102 = arith.constant 2.000000e+00 : f32
    %369 = vector.broadcast %cst_102 : f32 to vector<8x32xf32>
    %370 = arith.mulf %369, %368 : vector<8x32xf32>
    %cst_103 = arith.constant 1.000000e+00 : f32
    %371 = vector.broadcast %cst_103 : f32 to vector<8x32xf32>
    %372 = arith.subf %370, %371 : vector<8x32xf32>
    %373 = vector.extract_strided_slice %365 {offsets = [0, 96], sizes = [8, 32], strides = [1, 1]} : vector<8x128xf32> to vector<8x32xf32>
    %374 = arith.mulf %367, %353 : vector<8x32xf32>
    %375 = arith.mulf %366, %372 : vector<8x32xf32>
    %376 = arith.addf %374, %375 : vector<8x32xf32>
    %377 = math.tanh %376 : vector<8x32xf32>
    %378 = arith.mulf %373, %377 : vector<8x32xf32>
    %c56_104 = arith.constant 56 : index
    %c0_105 = arith.constant 0 : index
    %379 = vector.load %arg14[%c56_104, %c0_105] : memref<64x32xf32, #tpu.memory_space<vmem>>, vector<8x32xf32>
    tpu.vector_store %arg14[%c56_104, %c0_105], %378 {strides = array<i32>} : memref<64x32xf32, #tpu.memory_space<vmem>>, vector<8x32xf32>,
    %c0_106 = arith.constant 0 : index
    %c0_107 = arith.constant 0 : index
    %380 = vector.load %arg14[%c0_106, %c0_107] : memref<64x32xf32, #tpu.memory_space<vmem>>, vector<64x32xf32>
    %381 = arith.truncf %380 : vector<64x32xf32> to vector<64x32xbf16>
    %c0_108 = arith.constant 0 : index
    %c0_109 = arith.constant 0 : index
    %382 = vector.load %arg8[%c0_108, %c0_109] : memref<32x128xbf16, #tpu.memory_space<vmem>>, vector<32x128xbf16>
    %cst_110 = arith.constant dense<0.000000e+00> : vector<64x128xf32>
    %383 = tpu.matmul %381, %382, %cst_110 {dimension_numbers = #tpu.dot_dimension_numbers<[1], [0], [0], [1], [0, 0, 1, 1], [], []>} : vector<64x32xbf16>, vector<32x128xbf16>, vector<64x128xf32> -> vector<64x128xf32>
    %c0_111 = arith.constant 0 : index
    %c0_112 = arith.constant 0 : index
    %384 = vector.load %arg10[%c0_111, %c0_112] : memref<1x128xf32, #tpu.memory_space<vmem>>, vector<1x128xf32>
    %385 = vector.broadcast %384 : vector<1x128xf32> to vector<64x128xf32>
    %386 = arith.addf %383, %385 : vector<64x128xf32>
    %c0_113 = arith.constant 0 : index
    %c0_114 = arith.constant 0 : index
    %387 = vector.load %arg9[%c0_113, %c0_114] : memref<32x128xbf16, #tpu.memory_space<vmem>>, vector<32x128xbf16>
    %cst_115 = arith.constant 0.000000e+00 : f32
    %388 = vector.broadcast %cst_115 : f32 to vector<8x32xf32>
    %389 = vector.extract_strided_slice %386 {offsets = [0, 0], sizes = [8, 128], strides = [1, 1]} : vector<64x128xf32> to vector<8x128xf32>
    %390 = arith.negf %389 : vector<8x128xf32>
    %391 = math.exp %390 : vector<8x128xf32>
    %cst_116 = arith.constant 1.000000e+00 : f32
    %392 = vector.broadcast %cst_116 : f32 to vector<8x128xf32>
    %393 = arith.addf %392, %391 : vector<8x128xf32>
    %394 = arith.divf %392, %393 : vector<8x128xf32>
    %395 = vector.extract_strided_slice %394 {offsets = [0, 0], sizes = [8, 32], strides = [1, 1]} : vector<8x128xf32> to vector<8x32xf32>
    %396 = vector.extract_strided_slice %394 {offsets = [0, 32], sizes = [8, 32], strides = [1, 1]} : vector<8x128xf32> to vector<8x32xf32>
    %397 = vector.extract_strided_slice %394 {offsets = [0, 64], sizes = [8, 32], strides = [1, 1]} : vector<8x128xf32> to vector<8x32xf32>
    %cst_117 = arith.constant 2.000000e+00 : f32
    %398 = vector.broadcast %cst_117 : f32 to vector<8x32xf32>
    %399 = arith.mulf %398, %397 : vector<8x32xf32>
    %cst_118 = arith.constant 1.000000e+00 : f32
    %400 = vector.broadcast %cst_118 : f32 to vector<8x32xf32>
    %401 = arith.subf %399, %400 : vector<8x32xf32>
    %402 = vector.extract_strided_slice %394 {offsets = [0, 96], sizes = [8, 32], strides = [1, 1]} : vector<8x128xf32> to vector<8x32xf32>
    %403 = arith.mulf %396, %388 : vector<8x32xf32>
    %404 = arith.mulf %395, %401 : vector<8x32xf32>
    %405 = arith.addf %403, %404 : vector<8x32xf32>
    %406 = math.tanh %405 : vector<8x32xf32>
    %407 = arith.mulf %402, %406 : vector<8x32xf32>
    %408 = vector.extract_strided_slice %386 {offsets = [8, 0], sizes = [8, 128], strides = [1, 1]} : vector<64x128xf32> to vector<8x128xf32>
    %409 = arith.truncf %407 : vector<8x32xf32> to vector<8x32xbf16>
    %cst_119 = arith.constant dense<0.000000e+00> : vector<8x128xf32>
    %410 = tpu.matmul %409, %387, %cst_119 {dimension_numbers = #tpu.dot_dimension_numbers<[1], [0], [0], [1], [0, 0, 1, 1], [], []>} : vector<8x32xbf16>, vector<32x128xbf16>, vector<8x128xf32> -> vector<8x128xf32>
    %411 = arith.addf %408, %410 : vector<8x128xf32>
    %412 = arith.negf %411 : vector<8x128xf32>
    %413 = math.exp %412 : vector<8x128xf32>
    %cst_120 = arith.constant 1.000000e+00 : f32
    %414 = vector.broadcast %cst_120 : f32 to vector<8x128xf32>
    %415 = arith.addf %414, %413 : vector<8x128xf32>
    %416 = arith.divf %414, %415 : vector<8x128xf32>
    %417 = vector.extract_strided_slice %416 {offsets = [0, 0], sizes = [8, 32], strides = [1, 1]} : vector<8x128xf32> to vector<8x32xf32>
    %418 = vector.extract_strided_slice %416 {offsets = [0, 32], sizes = [8, 32], strides = [1, 1]} : vector<8x128xf32> to vector<8x32xf32>
    %419 = vector.extract_strided_slice %416 {offsets = [0, 64], sizes = [8, 32], strides = [1, 1]} : vector<8x128xf32> to vector<8x32xf32>
    %cst_121 = arith.constant 2.000000e+00 : f32
    %420 = vector.broadcast %cst_121 : f32 to vector<8x32xf32>
    %421 = arith.mulf %420, %419 : vector<8x32xf32>
    %cst_122 = arith.constant 1.000000e+00 : f32
    %422 = vector.broadcast %cst_122 : f32 to vector<8x32xf32>
    %423 = arith.subf %421, %422 : vector<8x32xf32>
    %424 = vector.extract_strided_slice %416 {offsets = [0, 96], sizes = [8, 32], strides = [1, 1]} : vector<8x128xf32> to vector<8x32xf32>
    %425 = arith.mulf %418, %405 : vector<8x32xf32>
    %426 = arith.mulf %417, %423 : vector<8x32xf32>
    %427 = arith.addf %425, %426 : vector<8x32xf32>
    %428 = math.tanh %427 : vector<8x32xf32>
    %429 = arith.mulf %424, %428 : vector<8x32xf32>
    %430 = vector.extract_strided_slice %386 {offsets = [16, 0], sizes = [8, 128], strides = [1, 1]} : vector<64x128xf32> to vector<8x128xf32>
    %431 = arith.truncf %429 : vector<8x32xf32> to vector<8x32xbf16>
    %cst_123 = arith.constant dense<0.000000e+00> : vector<8x128xf32>
    %432 = tpu.matmul %431, %387, %cst_123 {dimension_numbers = #tpu.dot_dimension_numbers<[1], [0], [0], [1], [0, 0, 1, 1], [], []>} : vector<8x32xbf16>, vector<32x128xbf16>, vector<8x128xf32> -> vector<8x128xf32>
    %433 = arith.addf %430, %432 : vector<8x128xf32>
    %434 = arith.negf %433 : vector<8x128xf32>
    %435 = math.exp %434 : vector<8x128xf32>
    %cst_124 = arith.constant 1.000000e+00 : f32
    %436 = vector.broadcast %cst_124 : f32 to vector<8x128xf32>
    %437 = arith.addf %436, %435 : vector<8x128xf32>
    %438 = arith.divf %436, %437 : vector<8x128xf32>
    %439 = vector.extract_strided_slice %438 {offsets = [0, 0], sizes = [8, 32], strides = [1, 1]} : vector<8x128xf32> to vector<8x32xf32>
    %440 = vector.extract_strided_slice %438 {offsets = [0, 32], sizes = [8, 32], strides = [1, 1]} : vector<8x128xf32> to vector<8x32xf32>
    %441 = vector.extract_strided_slice %438 {offsets = [0, 64], sizes = [8, 32], strides = [1, 1]} : vector<8x128xf32> to vector<8x32xf32>
    %cst_125 = arith.constant 2.000000e+00 : f32
    %442 = vector.broadcast %cst_125 : f32 to vector<8x32xf32>
    %443 = arith.mulf %442, %441 : vector<8x32xf32>
    %cst_126 = arith.constant 1.000000e+00 : f32
    %444 = vector.broadcast %cst_126 : f32 to vector<8x32xf32>
    %445 = arith.subf %443, %444 : vector<8x32xf32>
    %446 = vector.extract_strided_slice %438 {offsets = [0, 96], sizes = [8, 32], strides = [1, 1]} : vector<8x128xf32> to vector<8x32xf32>
    %447 = arith.mulf %440, %427 : vector<8x32xf32>
    %448 = arith.mulf %439, %445 : vector<8x32xf32>
    %449 = arith.addf %447, %448 : vector<8x32xf32>
    %450 = math.tanh %449 : vector<8x32xf32>
    %451 = arith.mulf %446, %450 : vector<8x32xf32>
    %452 = vector.extract_strided_slice %386 {offsets = [24, 0], sizes = [8, 128], strides = [1, 1]} : vector<64x128xf32> to vector<8x128xf32>
    %453 = arith.truncf %451 : vector<8x32xf32> to vector<8x32xbf16>
    %cst_127 = arith.constant dense<0.000000e+00> : vector<8x128xf32>
    %454 = tpu.matmul %453, %387, %cst_127 {dimension_numbers = #tpu.dot_dimension_numbers<[1], [0], [0], [1], [0, 0, 1, 1], [], []>} : vector<8x32xbf16>, vector<32x128xbf16>, vector<8x128xf32> -> vector<8x128xf32>
    %455 = arith.addf %452, %454 : vector<8x128xf32>
    %456 = arith.negf %455 : vector<8x128xf32>
    %457 = math.exp %456 : vector<8x128xf32>
    %cst_128 = arith.constant 1.000000e+00 : f32
    %458 = vector.broadcast %cst_128 : f32 to vector<8x128xf32>
    %459 = arith.addf %458, %457 : vector<8x128xf32>
    %460 = arith.divf %458, %459 : vector<8x128xf32>
    %461 = vector.extract_strided_slice %460 {offsets = [0, 0], sizes = [8, 32], strides = [1, 1]} : vector<8x128xf32> to vector<8x32xf32>
    %462 = vector.extract_strided_slice %460 {offsets = [0, 32], sizes = [8, 32], strides = [1, 1]} : vector<8x128xf32> to vector<8x32xf32>
    %463 = vector.extract_strided_slice %460 {offsets = [0, 64], sizes = [8, 32], strides = [1, 1]} : vector<8x128xf32> to vector<8x32xf32>
    %cst_129 = arith.constant 2.000000e+00 : f32
    %464 = vector.broadcast %cst_129 : f32 to vector<8x32xf32>
    %465 = arith.mulf %464, %463 : vector<8x32xf32>
    %cst_130 = arith.constant 1.000000e+00 : f32
    %466 = vector.broadcast %cst_130 : f32 to vector<8x32xf32>
    %467 = arith.subf %465, %466 : vector<8x32xf32>
    %468 = vector.extract_strided_slice %460 {offsets = [0, 96], sizes = [8, 32], strides = [1, 1]} : vector<8x128xf32> to vector<8x32xf32>
    %469 = arith.mulf %462, %449 : vector<8x32xf32>
    %470 = arith.mulf %461, %467 : vector<8x32xf32>
    %471 = arith.addf %469, %470 : vector<8x32xf32>
    %472 = math.tanh %471 : vector<8x32xf32>
    %473 = arith.mulf %468, %472 : vector<8x32xf32>
    %474 = vector.extract_strided_slice %386 {offsets = [32, 0], sizes = [8, 128], strides = [1, 1]} : vector<64x128xf32> to vector<8x128xf32>
    %475 = arith.truncf %473 : vector<8x32xf32> to vector<8x32xbf16>
    %cst_131 = arith.constant dense<0.000000e+00> : vector<8x128xf32>
    %476 = tpu.matmul %475, %387, %cst_131 {dimension_numbers = #tpu.dot_dimension_numbers<[1], [0], [0], [1], [0, 0, 1, 1], [], []>} : vector<8x32xbf16>, vector<32x128xbf16>, vector<8x128xf32> -> vector<8x128xf32>
    %477 = arith.addf %474, %476 : vector<8x128xf32>
    %478 = arith.negf %477 : vector<8x128xf32>
    %479 = math.exp %478 : vector<8x128xf32>
    %cst_132 = arith.constant 1.000000e+00 : f32
    %480 = vector.broadcast %cst_132 : f32 to vector<8x128xf32>
    %481 = arith.addf %480, %479 : vector<8x128xf32>
    %482 = arith.divf %480, %481 : vector<8x128xf32>
    %483 = vector.extract_strided_slice %482 {offsets = [0, 0], sizes = [8, 32], strides = [1, 1]} : vector<8x128xf32> to vector<8x32xf32>
    %484 = vector.extract_strided_slice %482 {offsets = [0, 32], sizes = [8, 32], strides = [1, 1]} : vector<8x128xf32> to vector<8x32xf32>
    %485 = vector.extract_strided_slice %482 {offsets = [0, 64], sizes = [8, 32], strides = [1, 1]} : vector<8x128xf32> to vector<8x32xf32>
    %cst_133 = arith.constant 2.000000e+00 : f32
    %486 = vector.broadcast %cst_133 : f32 to vector<8x32xf32>
    %487 = arith.mulf %486, %485 : vector<8x32xf32>
    %cst_134 = arith.constant 1.000000e+00 : f32
    %488 = vector.broadcast %cst_134 : f32 to vector<8x32xf32>
    %489 = arith.subf %487, %488 : vector<8x32xf32>
    %490 = vector.extract_strided_slice %482 {offsets = [0, 96], sizes = [8, 32], strides = [1, 1]} : vector<8x128xf32> to vector<8x32xf32>
    %491 = arith.mulf %484, %471 : vector<8x32xf32>
    %492 = arith.mulf %483, %489 : vector<8x32xf32>
    %493 = arith.addf %491, %492 : vector<8x32xf32>
    %494 = math.tanh %493 : vector<8x32xf32>
    %495 = arith.mulf %490, %494 : vector<8x32xf32>
    %496 = vector.extract_strided_slice %386 {offsets = [40, 0], sizes = [8, 128], strides = [1, 1]} : vector<64x128xf32> to vector<8x128xf32>
    %497 = arith.truncf %495 : vector<8x32xf32> to vector<8x32xbf16>
    %cst_135 = arith.constant dense<0.000000e+00> : vector<8x128xf32>
    %498 = tpu.matmul %497, %387, %cst_135 {dimension_numbers = #tpu.dot_dimension_numbers<[1], [0], [0], [1], [0, 0, 1, 1], [], []>} : vector<8x32xbf16>, vector<32x128xbf16>, vector<8x128xf32> -> vector<8x128xf32>
    %499 = arith.addf %496, %498 : vector<8x128xf32>
    %500 = arith.negf %499 : vector<8x128xf32>
    %501 = math.exp %500 : vector<8x128xf32>
    %cst_136 = arith.constant 1.000000e+00 : f32
    %502 = vector.broadcast %cst_136 : f32 to vector<8x128xf32>
    %503 = arith.addf %502, %501 : vector<8x128xf32>
    %504 = arith.divf %502, %503 : vector<8x128xf32>
    %505 = vector.extract_strided_slice %504 {offsets = [0, 0], sizes = [8, 32], strides = [1, 1]} : vector<8x128xf32> to vector<8x32xf32>
    %506 = vector.extract_strided_slice %504 {offsets = [0, 32], sizes = [8, 32], strides = [1, 1]} : vector<8x128xf32> to vector<8x32xf32>
    %507 = vector.extract_strided_slice %504 {offsets = [0, 64], sizes = [8, 32], strides = [1, 1]} : vector<8x128xf32> to vector<8x32xf32>
    %cst_137 = arith.constant 2.000000e+00 : f32
    %508 = vector.broadcast %cst_137 : f32 to vector<8x32xf32>
    %509 = arith.mulf %508, %507 : vector<8x32xf32>
    %cst_138 = arith.constant 1.000000e+00 : f32
    %510 = vector.broadcast %cst_138 : f32 to vector<8x32xf32>
    %511 = arith.subf %509, %510 : vector<8x32xf32>
    %512 = vector.extract_strided_slice %504 {offsets = [0, 96], sizes = [8, 32], strides = [1, 1]} : vector<8x128xf32> to vector<8x32xf32>
    %513 = arith.mulf %506, %493 : vector<8x32xf32>
    %514 = arith.mulf %505, %511 : vector<8x32xf32>
    %515 = arith.addf %513, %514 : vector<8x32xf32>
    %516 = math.tanh %515 : vector<8x32xf32>
    %517 = arith.mulf %512, %516 : vector<8x32xf32>
    %518 = vector.extract_strided_slice %386 {offsets = [48, 0], sizes = [8, 128], strides = [1, 1]} : vector<64x128xf32> to vector<8x128xf32>
    %519 = arith.truncf %517 : vector<8x32xf32> to vector<8x32xbf16>
    %cst_139 = arith.constant dense<0.000000e+00> : vector<8x128xf32>
    %520 = tpu.matmul %519, %387, %cst_139 {dimension_numbers = #tpu.dot_dimension_numbers<[1], [0], [0], [1], [0, 0, 1, 1], [], []>} : vector<8x32xbf16>, vector<32x128xbf16>, vector<8x128xf32> -> vector<8x128xf32>
    %521 = arith.addf %518, %520 : vector<8x128xf32>
    %522 = arith.negf %521 : vector<8x128xf32>
    %523 = math.exp %522 : vector<8x128xf32>
    %cst_140 = arith.constant 1.000000e+00 : f32
    %524 = vector.broadcast %cst_140 : f32 to vector<8x128xf32>
    %525 = arith.addf %524, %523 : vector<8x128xf32>
    %526 = arith.divf %524, %525 : vector<8x128xf32>
    %527 = vector.extract_strided_slice %526 {offsets = [0, 0], sizes = [8, 32], strides = [1, 1]} : vector<8x128xf32> to vector<8x32xf32>
    %528 = vector.extract_strided_slice %526 {offsets = [0, 32], sizes = [8, 32], strides = [1, 1]} : vector<8x128xf32> to vector<8x32xf32>
    %529 = vector.extract_strided_slice %526 {offsets = [0, 64], sizes = [8, 32], strides = [1, 1]} : vector<8x128xf32> to vector<8x32xf32>
    %cst_141 = arith.constant 2.000000e+00 : f32
    %530 = vector.broadcast %cst_141 : f32 to vector<8x32xf32>
    %531 = arith.mulf %530, %529 : vector<8x32xf32>
    %cst_142 = arith.constant 1.000000e+00 : f32
    %532 = vector.broadcast %cst_142 : f32 to vector<8x32xf32>
    %533 = arith.subf %531, %532 : vector<8x32xf32>
    %534 = vector.extract_strided_slice %526 {offsets = [0, 96], sizes = [8, 32], strides = [1, 1]} : vector<8x128xf32> to vector<8x32xf32>
    %535 = arith.mulf %528, %515 : vector<8x32xf32>
    %536 = arith.mulf %527, %533 : vector<8x32xf32>
    %537 = arith.addf %535, %536 : vector<8x32xf32>
    %538 = math.tanh %537 : vector<8x32xf32>
    %539 = arith.mulf %534, %538 : vector<8x32xf32>
    %540 = vector.extract_strided_slice %386 {offsets = [56, 0], sizes = [8, 128], strides = [1, 1]} : vector<64x128xf32> to vector<8x128xf32>
    %541 = arith.truncf %539 : vector<8x32xf32> to vector<8x32xbf16>
    %cst_143 = arith.constant dense<0.000000e+00> : vector<8x128xf32>
    %542 = tpu.matmul %541, %387, %cst_143 {dimension_numbers = #tpu.dot_dimension_numbers<[1], [0], [0], [1], [0, 0, 1, 1], [], []>} : vector<8x32xbf16>, vector<32x128xbf16>, vector<8x128xf32> -> vector<8x128xf32>
    %543 = arith.addf %540, %542 : vector<8x128xf32>
    %544 = arith.negf %543 : vector<8x128xf32>
    %545 = math.exp %544 : vector<8x128xf32>
    %cst_144 = arith.constant 1.000000e+00 : f32
    %546 = vector.broadcast %cst_144 : f32 to vector<8x128xf32>
    %547 = arith.addf %546, %545 : vector<8x128xf32>
    %548 = arith.divf %546, %547 : vector<8x128xf32>
    %549 = vector.extract_strided_slice %548 {offsets = [0, 0], sizes = [8, 32], strides = [1, 1]} : vector<8x128xf32> to vector<8x32xf32>
    %550 = vector.extract_strided_slice %548 {offsets = [0, 32], sizes = [8, 32], strides = [1, 1]} : vector<8x128xf32> to vector<8x32xf32>
    %551 = vector.extract_strided_slice %548 {offsets = [0, 64], sizes = [8, 32], strides = [1, 1]} : vector<8x128xf32> to vector<8x32xf32>
    %cst_145 = arith.constant 2.000000e+00 : f32
    %552 = vector.broadcast %cst_145 : f32 to vector<8x32xf32>
    %553 = arith.mulf %552, %551 : vector<8x32xf32>
    %cst_146 = arith.constant 1.000000e+00 : f32
    %554 = vector.broadcast %cst_146 : f32 to vector<8x32xf32>
    %555 = arith.subf %553, %554 : vector<8x32xf32>
    %556 = vector.extract_strided_slice %548 {offsets = [0, 96], sizes = [8, 32], strides = [1, 1]} : vector<8x128xf32> to vector<8x32xf32>
    %557 = arith.mulf %550, %537 : vector<8x32xf32>
    %558 = arith.mulf %549, %555 : vector<8x32xf32>
    %559 = arith.addf %557, %558 : vector<8x32xf32>
    %560 = math.tanh %559 : vector<8x32xf32>
    %561 = arith.mulf %556, %560 : vector<8x32xf32>
    %c0_147 = arith.constant 0 : index
    %c0_148 = arith.constant 0 : index
    %562 = vector.load %arg11[%c0_147, %c0_148] : memref<8x32xf32, #tpu.memory_space<vmem>>, vector<8x32xf32>
    %cst_149 = arith.constant dense<0.000000e+00> : vector<8x8xf32>
    %563 = tpu.matmul %562, %561, %cst_149 {dimension_numbers = #tpu.dot_dimension_numbers<[1], [1], [0], [0], [0, 0, 1, 0], [], []>} : vector<8x32xf32>, vector<8x32xf32>, vector<8x8xf32> -> vector<8x8xf32>
    %564 = vector.extract_strided_slice %563 {offsets = [0, 0], sizes = [1, 8], strides = [1, 1]} : vector<8x8xf32> to vector<1x8xf32>
    %c0_150 = arith.constant 0 : index
    %c0_151 = arith.constant 0 : index
    %565 = vector.load %arg12[%c0_150, %c0_151] : memref<1x1xf32, #tpu.memory_space<vmem>>, vector<1x1xf32>
    %566 = vector.broadcast %565 : vector<1x1xf32> to vector<1x8xf32>
    %567 = arith.addf %564, %566 : vector<1x8xf32>
    %568 = arith.negf %567 : vector<1x8xf32>
    %569 = math.exp %568 : vector<1x8xf32>
    %cst_152 = arith.constant 1.000000e+00 : f32
    %570 = vector.broadcast %cst_152 : f32 to vector<1x8xf32>
    %571 = arith.addf %570, %569 : vector<1x8xf32>
    %572 = arith.divf %570, %571 : vector<1x8xf32>
    %c0_153 = arith.constant 0 : index
    %c0_154 = arith.constant 0 : index
    %c0_155 = arith.constant 0 : index
    %573 = vector.load %arg13[%c0_153, %c0_154, %c0_155] : memref<1x1x8xf32, #tpu.memory_space<vmem>>, vector<1x1x8xf32>
    %574 = vector.shape_cast %573 : vector<1x1x8xf32> to vector<1x8xf32>
    %575 = vector.shape_cast %572 : vector<1x8xf32> to vector<1x1x8xf32>
    tpu.vector_store %arg13[%c0_153, %c0_154, %c0_155], %575 {strides = array<i32>} : memref<1x1x8xf32, #tpu.memory_space<vmem>>, vector<1x1x8xf32>,
    return
  }
  func.func @transform_0(%arg0: i32) -> (i32, i32, i32) {
    %c0_i32 = arith.constant 0 : i32
    %c0_i32_0 = arith.constant 0 : i32
    %c0_i32_1 = arith.constant 0 : i32
    return %arg0, %c0_i32, %c0_i32_0 : i32, i32, i32
  }
  func.func @transform_1(%arg0: i32) -> (i32, i32) {
    %c0_i32 = arith.constant 0 : i32
    %c0_i32_0 = arith.constant 0 : i32
    %c0_i32_1 = arith.constant 0 : i32
    return %c0_i32, %c0_i32_0 : i32, i32
  }
  func.func @transform_2(%arg0: i32) -> (i32, i32) {
    %c0_i32 = arith.constant 0 : i32
    %c0_i32_0 = arith.constant 0 : i32
    %c0_i32_1 = arith.constant 0 : i32
    return %c0_i32, %c0_i32_0 : i32, i32
  }
  func.func @transform_3(%arg0: i32) -> (i32, i32) {
    %c0_i32 = arith.constant 0 : i32
    %c0_i32_0 = arith.constant 0 : i32
    %c0_i32_1 = arith.constant 0 : i32
    return %c0_i32, %c0_i32_0 : i32, i32
  }
  func.func @transform_4(%arg0: i32) -> (i32, i32) {
    %c0_i32 = arith.constant 0 : i32
    %c0_i32_0 = arith.constant 0 : i32
    %c0_i32_1 = arith.constant 0 : i32
    return %c0_i32, %c0_i32_0 : i32, i32
  }
  func.func @transform_5(%arg0: i32) -> (i32, i32) {
    %c0_i32 = arith.constant 0 : i32
    %c0_i32_0 = arith.constant 0 : i32
    %c0_i32_1 = arith.constant 0 : i32
    return %c0_i32, %c0_i32_0 : i32, i32
  }
  func.func @transform_6(%arg0: i32) -> (i32, i32) {
    %c0_i32 = arith.constant 0 : i32
    %c0_i32_0 = arith.constant 0 : i32
    %c0_i32_1 = arith.constant 0 : i32
    return %c0_i32, %c0_i32_0 : i32, i32
  }
  func.func @transform_7(%arg0: i32) -> (i32, i32) {
    %c0_i32 = arith.constant 0 : i32
    %c0_i32_0 = arith.constant 0 : i32
    %c0_i32_1 = arith.constant 0 : i32
    return %c0_i32, %c0_i32_0 : i32, i32
  }
  func.func @transform_8(%arg0: i32) -> (i32, i32) {
    %c0_i32 = arith.constant 0 : i32
    %c0_i32_0 = arith.constant 0 : i32
    %c0_i32_1 = arith.constant 0 : i32
    return %c0_i32, %c0_i32_0 : i32, i32
  }
  func.func @transform_9(%arg0: i32) -> (i32, i32) {
    %c0_i32 = arith.constant 0 : i32
    %c0_i32_0 = arith.constant 0 : i32
    %c0_i32_1 = arith.constant 0 : i32
    return %c0_i32, %c0_i32_0 : i32, i32
  }
  func.func @transform_10(%arg0: i32) -> (i32, i32) {
    %c0_i32 = arith.constant 0 : i32
    %c0_i32_0 = arith.constant 0 : i32
    %c0_i32_1 = arith.constant 0 : i32
    return %c0_i32, %c0_i32_0 : i32, i32
  }
  func.func @transform_11(%arg0: i32) -> (i32, i32) {
    %c0_i32 = arith.constant 0 : i32
    %c0_i32_0 = arith.constant 0 : i32
    %c0_i32_1 = arith.constant 0 : i32
    return %c0_i32, %c0_i32_0 : i32, i32
  }
  func.func @transform_12(%arg0: i32) -> (i32, i32, i32) {
    %c0_i32 = arith.constant 0 : i32
    %c0_i32_0 = arith.constant 0 : i32
    %c0_i32_1 = arith.constant 0 : i32
    return %arg0, %c0_i32, %c0_i32_0 : i32, i32, i32
  }
}

</mosaic_0001>

<bundles_post_ra>
// kernel: question_detector_forward.1
= control target key start
LH: loop header
LB: loop body
LE: loop exit
PB: predicated region body
PF: predicated region fallthrough
CT: control target
= control target key end

     0   :  { %vm87_vm0 = vcmask 130048   ;;  %v2790_v20 = vmov 0.0   ;;  %vm2791_vm1 = vmmov 0   ;;  %vm198_vm2 = vcmask 261120   ;;  %s3398_s1 = inlined_call_operand.vmem [shape: bf16[16,128], index: 1, kind: input, shape index: {}]   ;;  %s3399_s0 = inlined_call_operand.vmem [shape: bf16[1,64,16], index: 0, kind: input, shape index: {}]   ;;  %s3400_s3 = inlined_call_operand.vmem [shape: f32[1,128], index: 3, kind: input, shape index: {}]   ;;  %s3401_s2 = inlined_call_operand.vmem [shape: bf16[32,128], index: 2, kind: input, shape index: {}]   ;;  %s3402_s4 = inlined_call_operand.vmem [shape: bf16[32,128], index: 4, kind: input, shape index: {}]   ;;  %s3403_s6 = inlined_call_operand.vmem [shape: f32[1,128], index: 6, kind: input, shape index: {}]   ;;  %s3404_s5 = inlined_call_operand.vmem [shape: bf16[32,128], index: 5, kind: input, shape index: {}]   ;;  %s3405_s7 = inlined_call_operand.vmem [shape: bf16[32,128], index: 7, kind: input, shape index: {}]   ;;  %s3406_s9 = inlined_call_operand.vmem [shape: f32[1,128], index: 9, kind: input, shape index: {}]   ;;  %s3407_s8 = inlined_call_operand.vmem [shape: bf16[32,128], index: 8, kind: input, shape index: {}]   ;;  %s3408_s11 = inlined_call_operand.<no memory space> [shape: f32[1,1], index: 11, kind: input, shape index: {}]   ;;  %s3409_s10 = inlined_call_operand.vmem [shape: f32[8,32], index: 10, kind: input, shape index: {}]   ;;  %s3410_s12 = inlined_call_operand.vmem [shape: f32[1,1,8], index: 12, kind: output, shape index: {}]  }
   0x1   :  { %v2625_v0 = vld [vmem:[%s3398_s1] sm:$0xff]   ;;  %v2627_v2 = vld [vmem:[%s3399_s0 + $0x8] sm:$0xff]   ;;  %s2788_s1 = smov 64   ;;  %2422 = vmatprep.subr.bf16.mxu1 %v2790_v20  ;;  %2426 = vmatprep.mubr.msk.bf16.mxu1 %vm2791_vm1, %v2790_v20  ;;  %vm2222_vm3 = vcmask 57344  }
   0x2   :  { %v2626_v1 = vld [vmem:[%s3399_s0] sm:$0xff]   ;;  %2412 = vmatprep.subr.bf16.mxu0 %v2625_v0  ;;  %v2894_v22 = vld [vmem:[%s3401_s2 + $0x8] sm:$0xff]  }
   0x3   :  { %2413 = vmatpush3.bf16.msra.mxu0 %v2625_v0  ;;  %2414 = vmatprep.mubr.msk.bf16.mxu0 %vm87_vm0, %v2626_v1  ;;  %v2872_v3 = vld [vmem:[%s3400_s3] ss:$0 sm:$0xff]  ;;  %s2789_s3 = smov 32  }
   0x4   :  { %v2885_v21 = vld [vmem:[%s3401_s2] sm:$0xff]   ;;  %2438 = vmatprep.subr.bf16.mxu0 %v2790_v20 }
   0x5   :  { %2423 = vmatpush3.bf16.msra.mxu1 %v2885_v21 }
   0x6   :  { %2415 = vmatmul.mubr.msk.bf16.vlgmr.msra.gmra.mrb[0].mxu0 %vm87_vm0, %v2627_v2  ;;  %2424 = vmatprep.subr.bf16.mxu1 %v2790_v20 }
   0x7   :  { %2439 = vmatpush3.bf16.msra.mxu0 %v2885_v21 }
   0x8   :  { %2440 = vmatprep.subr.bf16.mxu0 %v2790_v20 }
   0x9   :  { %2425 = vmatpush3.bf16.msra.mxu1 %v2894_v22 }
   0xa   :  { %2430 = vmatprep.subr.bf16.mxu1 %v2790_v20 }
   0xb   :  { %2441 = vmatpush3.bf16.msra.mxu0 %v2894_v22 }
   0xc   :  { %2454 = vmatprep.subr.bf16.mxu0 %v2790_v20 }
  0xd9   :  { %v2874_v4 = vpop.f32.mrb[0].mxu0 }
  0xda   :  { %v134_v5 = vpop.f32.mrb[1].mxu0  ;;  %v143_v50 = vadd.f32 %v2874_v4, %v2872_v3  ;;  %v2630_v4 = vld [vmem:[%s3399_s0 + $0x10] sm:$0xff]  }
  0xdb   :  { %v135_v6 = vadd.f32 %v2872_v3, %v134_v5  ;;  %v2877_v7 = vpop.f32.mrb[2].mxu0  ;;  %v2631_v5 = vld [vmem:[%s3399_s0 + $0x18] sm:$0xff]   ;;  %2418 = vmatprep.mubr.msk.bf16.mxu0 %vm87_vm0, %v2630_v4 }
  0xdc   :  { %v137_v8 = vpop.f32.mrb[3].mxu0  ;;  %2419 = vmatmul.mubr.msk.bf16.gmra.mrb[4].mxu0 %vm87_vm0, %v2631_v5 }
  0xdd   :  { %v2238_v9 = vmul.f32 -1.442695, %v135_v6  ;;  %v138_v28 = vadd.f32 %v2872_v3, %v137_v8  ;;  %2442 = vmatprep.mubr.msk.bf16.mxu0 %vm2791_vm1, %v2790_v20 }
  0xdf   :  { %2640 = vpow2.f32 %v2238_v9 }
  0xe9   :  { %v2641_v10 = vpop.eup %2640 }
  0xea   :  { %v172_v11 = vadd.f32 1.0, %v2641_v10 }
  0xec   :  { %2642 = vrcp.f32 %v172_v11 }
  0xf6   :  { %v2643_v12 = vpop.eup %2642 }
  0xf7   :  { %v175_v13 = vmul.f32 2.0, %v2643_v12  ;;  %v177_v17 = vmul.f32 0.0, %v2643_v12 }
  0xf9   :  { %v2239_v14 = vadd.f32 -1.0, %v175_v13 }
  0xfb   :  { %179 = vrot.lane.b32.xlu0 %v2239_v14, %s2788_s1 }
 0x16d   :  { %v180_v15 = vpop.permute.xlu0 %179 }
 0x16e   :  { %v182_v16 = vmul.f32 %v2643_v12, %v180_v15 }
 0x170   :  { %184 = vrot.lane.b32.xlu0 %v182_v16, %s2789_s3  ;;  %v146_v16 = vadd.f32 %v2877_v7, %v2872_v3 }
 0x1af   :  { %v2952_v11 = vpop.f32.mrb[4].mxu0 }
 0x1e2   :  { %v185_v18 = vpop.permute.xlu0 %184 }
 0x1e3   :  { %v187_v19 = vadd.f32 %v185_v18, %v177_v17 }
 0x1e5   :  { %2644 = vtanh.f32 %v187_v19 }
 0x1ef   :  { %v2645_v23 = vpop.eup %2644 }
 0x1f0   :  { %190 = vrot.lane.b32.xlu1 %v2645_v23, %s2788_s1 }
 0x262   :  { %v191_v24 = vpop.permute.xlu1 %190 }
 0x263   :  { %v2904_v25 = vmul.f32 %v2643_v12, %v191_v24  ;;  %v150_v12 = vpop.f32.mrb[5].mxu0 }
 0x264   :  { %v2954_v13 = vpop.f32.mrb[6].mxu0 }
 0x265   :  { %v200_v26 = vpack.c.bf16 %v2904_v25, %v2904_v25  ;;  %v2956_v14 = vpop.f32.mrb[7].mxu0 }
 0x267   :  { %202 = vrot.lane.b32.xlu1 %v200_v26, %s2789_s3 }
 0x2d9   :  { %v203_v27 = vpop.permute.xlu1 %202 }
 0x2da   :  { %2427 = vmatmul.mubr.msk.bf16.vlgmr.msra.gmra.mrb[0].mxu1 %vm198_vm2, %v203_v27 }
 0x2db   :  { %2431 = vmatpush3.bf16.msra.mxu1 %v2885_v21  ;;  %2434 = vmatprep.mubr.msk.bf16.mxu1 %vm2791_vm1, %v2790_v20 }
 0x2dc   :  { %2432 = vmatprep.subr.bf16.mxu1 %v2790_v20 }
 0x2df   :  { %2433 = vmatpush3.bf16.msra.mxu1 %v2894_v22 }
 0x2e0   :  { %2446 = vmatprep.subr.bf16.mxu1 %v2790_v20 }
 0x3ad   :  { %v253_v29 = vpop.f32.mrb[0].mxu1 }
 0x3ae   :  { %v259_v30 = vadd.f32 %v253_v29, %v138_v28  ;;  %v2428_v31 = vpop.f32.mrb[1].mxu1 }
 0x3af   :  { %v256_v32 = vpop.f32.mrb[2].mxu1 }
 0x3b0   :  { %v2243_v33 = vmul.f32 -1.442695, %v259_v30  ;;  %v2429_v34 = vpop.f32.mrb[3].mxu1 }
 0x3b2   :  { %2646 = vpow2.f32 %v2243_v33 }
 0x3bc   :  { %v2647_v35 = vpop.eup %2646 }
 0x3bd   :  { %v263_v36 = vadd.f32 1.0, %v2647_v35 }
 0x3bf   :  { %2648 = vrcp.f32 %v263_v36 }
 0x3c9   :  { %v2649_v37 = vpop.eup %2648 }
 0x3ca   :  { %v266_v38 = vmul.f32 2.0, %v2649_v37  ;;  %v268_v42 = vmul.f32 %v2649_v37, %v187_v19 }
 0x3cc   :  { %v2244_v39 = vadd.f32 -1.0, %v266_v38 }
 0x3ce   :  { %270 = vrot.lane.b32.xlu0 %v2244_v39, %s2788_s1 }
 0x440   :  { %v271_v40 = vpop.permute.xlu0 %270 }
 0x441   :  { %v273_v41 = vmul.f32 %v2649_v37, %v271_v40 }
 0x443   :  { %275 = vrot.lane.b32.xlu1 %v273_v41, %s2789_s3  ;;  %v151_v41 = vadd.f32 %v2872_v3, %v150_v12 }
 0x4b5   :  { %v276_v43 = vpop.permute.xlu1 %275 }
 0x4b6   :  { %v278_v44 = vadd.f32 %v276_v43, %v268_v42 }
 0x4b8   :  { %2650 = vtanh.f32 %v278_v44 }
 0x4c2   :  { %v2651_v45 = vpop.eup %2650 }
 0x4c3   :  { %281 = vrot.lane.b32.xlu0 %v2651_v45, %s2788_s1 }
 0x535   :  { %v282_v46 = vpop.permute.xlu0 %281 }
 0x536   :  { %v2920_v47 = vmul.f32 %v2649_v37, %v282_v46 }
 0x538   :  { %v290_v48 = vpack.c.bf16 %v2920_v47, %v2920_v47 }
 0x53a   :  { %292 = vrot.lane.b32.xlu1 %v290_v48, %s2789_s3 }
 0x5ac   :  { %v293_v49 = vpop.permute.xlu1 %292 }
 0x5ad   :  { %2435 = vmatmul.mubr.msk.bf16.vlgmr.msra.gmra.mrb[4].mxu1 %vm198_vm2, %v293_v49 }
 0x5ae   :  { %2447 = vmatpush3.bf16.msra.mxu1 %v2885_v21  ;;  %2450 = vmatprep.mubr.msk.bf16.mxu1 %vm2791_vm1, %v2790_v20 }
 0x5af   :  { %2448 = vmatprep.subr.bf16.mxu1 %v2790_v20 }
 0x5b2   :  { %2449 = vmatpush3.bf16.msra.mxu1 %v2894_v22 }
 0x5b3   :  { %2462 = vmatprep.subr.bf16.mxu1 %v2790_v20 }
 0x680   :  { %v331_v51 = vpop.f32.mrb[4].mxu1 }
 0x681   :  { %v337_v52 = vadd.f32 %v331_v51, %v143_v50  ;;  %v2436_v53 = vpop.f32.mrb[5].mxu1 }
 0x682   :  { %v334_v54 = vpop.f32.mrb[6].mxu1 }
 0x683   :  { %v2246_v55 = vmul.f32 -1.442695, %v337_v52  ;;  %v2437_v56 = vpop.f32.mrb[7].mxu1 }
 0x685   :  { %2652 = vpow2.f32 %v2246_v55 }
 0x68f   :  { %v2653_v57 = vpop.eup %2652 }
 0x690   :  { %v341_v58 = vadd.f32 1.0, %v2653_v57 }
 0x692   :  { %2654 = vrcp.f32 %v341_v58 }
 0x69c   :  { %v2655_v59 = vpop.eup %2654 }
 0x69d   :  { %v344_v60 = vmul.f32 2.0, %v2655_v59  ;;  %v346_v0 = vmul.f32 %v2655_v59, %v278_v44 }
 0x69f   :  { %v2247_v61 = vadd.f32 -1.0, %v344_v60 }
 0x6a1   :  { %348 = vrot.lane.b32.xlu0 %v2247_v61, %s2788_s1 }
 0x713   :  { %v349_v62 = vpop.permute.xlu0 %348 }
 0x714   :  { %v351_v63 = vmul.f32 %v2655_v59, %v349_v62 }
 0x716   :  { %353 = vrot.lane.b32.xlu1 %v351_v63, %s2789_s3 }
 0x788   :  { %v354_v1 = vpop.permute.xlu1 %353 }
 0x789   :  { %v356_v2 = vadd.f32 %v354_v1, %v346_v0  ;;  %v154_v0 = vadd.f32 %v2872_v3, %v2956_v14 }
 0x78b   :  { %2656 = vtanh.f32 %v356_v2 }
 0x795   :  { %v2657_v6 = vpop.eup %2656 }
 0x796   :  { %359 = vrot.lane.b32.xlu0 %v2657_v6, %s2788_s1 }
 0x808   :  { %v360_v8 = vpop.permute.xlu0 %359 }
 0x809   :  { %v2947_v9 = vmul.f32 %v2655_v59, %v360_v8 }
 0x80b   :  { %v368_v10 = vpack.c.bf16 %v2947_v9, %v2947_v9 }
 0x80d   :  { %370 = vrot.lane.b32.xlu1 %v368_v10, %s2789_s3 }
 0x87f   :  { %v371_v15 = vpop.permute.xlu1 %370 }
 0x880   :  { %2443 = vmatmul.mubr.msk.bf16.vlgmr.msra.gmra.mrb[8].mxu0 %vm198_vm2, %v371_v15 }
 0x881   :  { %2455 = vmatpush3.bf16.msra.mxu0 %v2885_v21  ;;  %2458 = vmatprep.mubr.msk.bf16.mxu0 %vm2791_vm1, %v2790_v20 }
 0x882   :  { %2456 = vmatprep.subr.bf16.mxu0 %v2790_v20 }
 0x885   :  { %2457 = vmatpush3.bf16.msra.mxu0 %v2894_v22 }
 0x886   :  { %2470 = vmatprep.subr.bf16.mxu0 %v2790_v20 }
 0x953   :  { %v409_v17 = vpop.f32.mrb[8].mxu0 }
 0x954   :  { %v415_v18 = vadd.f32 %v409_v17, %v146_v16  ;;  %v2444_v19 = vpop.f32.mrb[9].mxu0 }
 0x955   :  { %v412_v23 = vpop.f32.mrb[10].mxu0 }
 0x956   :  { %v2249_v24 = vmul.f32 -1.442695, %v415_v18  ;;  %v2445_v26 = vpop.f32.mrb[11].mxu0 }
 0x958   :  { %2658 = vpow2.f32 %v2249_v24 }
 0x962   :  { %v2659_v27 = vpop.eup %2658 }
 0x963   :  { %v419_v28 = vadd.f32 1.0, %v2659_v27 }
 0x965   :  { %2660 = vrcp.f32 %v419_v28 }
 0x96f   :  { %v2661_v29 = vpop.eup %2660 }
 0x970   :  { %v422_v30 = vmul.f32 2.0, %v2661_v29  ;;  %v424_v7 = vmul.f32 %v2661_v29, %v356_v2 }
 0x972   :  { %v2250_v31 = vadd.f32 -1.0, %v422_v30 }
 0x974   :  { %426 = vrot.lane.b32.xlu0 %v2250_v31, %s2788_s1 }
 0x9e6   :  { %v427_v32 = vpop.permute.xlu0 %426 }
 0x9e7   :  { %v429_v33 = vmul.f32 %v2661_v29, %v427_v32  ;;  %v2633_v32 = vld [vmem:[%s3402_s4 + $0x8] sm:$0xff]  }
 0x9e9   :  { %431 = vrot.lane.b32.xlu1 %v429_v33, %s2789_s3 }
 0xa5b   :  { %v432_v34 = vpop.permute.xlu1 %431 }
 0xa5c   :  { %v434_v35 = vadd.f32 %v432_v34, %v424_v7 }
 0xa5e   :  { %2662 = vtanh.f32 %v434_v35 }
 0xa68   :  { %v2663_v36 = vpop.eup %2662 }
 0xa69   :  { %437 = vrot.lane.b32.xlu0 %v2663_v36, %s2788_s1 }
 0xadb   :  { %v438_v37 = vpop.permute.xlu0 %437 }
 0xadc   :  { %v2970_v38 = vmul.f32 %v2661_v29, %v438_v37  ;;  %v159_v37 = vadd.f32 %v2952_v11, %v2872_v3 }
 0xade   :  { %v446_v39 = vpack.c.bf16 %v2970_v38, %v2970_v38 }
 0xae0   :  { %448 = vrot.lane.b32.xlu1 %v446_v39, %s2789_s3 }
 0xb52   :  { %v449_v40 = vpop.permute.xlu1 %448 }
 0xb53   :  { %2451 = vmatmul.mubr.msk.bf16.vlgmr.msra.gmra.mrb[8].mxu1 %vm198_vm2, %v449_v40 }
 0xb54   :  { %2463 = vmatpush3.bf16.msra.mxu1 %v2885_v21  ;;  %2466 = vmatprep.mubr.msk.bf16.mxu1 %vm2791_vm1, %v2790_v20 }
 0xb55   :  { %2464 = vmatprep.subr.bf16.mxu1 %v2790_v20 }
 0xb58   :  { %2465 = vmatpush3.bf16.msra.mxu1 %v2894_v22 }
 0xc26   :  { %v487_v42 = vpop.f32.mrb[8].mxu1 }
 0xc27   :  { %v493_v43 = vadd.f32 %v487_v42, %v151_v41  ;;  %v2452_v44 = vpop.f32.mrb[9].mxu1 }
 0xc28   :  { %v490_v45 = vpop.f32.mrb[10].mxu1  ;;  %v3037_v44 = vld [vmem:[%s3403_s6] ss:$0 sm:$0xff] }
 0xc29   :  { %v2252_v46 = vmul.f32 -1.442695, %v493_v43  ;;  %v2453_v48 = vpop.f32.mrb[11].mxu1 }
 0xc2b   :  { %2664 = vpow2.f32 %v2252_v46 }
 0xc35   :  { %v2665_v49 = vpop.eup %2664 }
 0xc36   :  { %v497_v50 = vadd.f32 1.0, %v2665_v49 }
 0xc38   :  { %2666 = vrcp.f32 %v497_v50 }
 0xc42   :  { %v2667_v51 = vpop.eup %2666 }
 0xc43   :  { %v500_v52 = vmul.f32 2.0, %v2667_v51  ;;  %v502_v56 = vmul.f32 %v2667_v51, %v434_v35 }
 0xc45   :  { %v2253_v53 = vadd.f32 -1.0, %v500_v52 }
 0xc47   :  { %504 = vrot.lane.b32.xlu0 %v2253_v53, %s2788_s1 }
 0xcb9   :  { %v505_v54 = vpop.permute.xlu0 %504 }
 0xcba   :  { %v507_v55 = vmul.f32 %v2667_v51, %v505_v54 }
 0xcbc   :  { %509 = vrot.lane.b32.xlu1 %v507_v55, %s2789_s3 }
 0xd2e   :  { %v510_v57 = vpop.permute.xlu1 %509 }
 0xd2f   :  { %v512_v58 = vadd.f32 %v510_v57, %v502_v56 }
 0xd31   :  { %2668 = vtanh.f32 %v512_v58 }
 0xd3b   :  { %v2669_v59 = vpop.eup %2668 }
 0xd3c   :  { %515 = vrot.lane.b32.xlu0 %v2669_v59, %s2788_s1 }
 0xdae   :  { %v516_v60 = vpop.permute.xlu0 %515 }
 0xdaf   :  { %v2985_v61 = vmul.f32 %v2667_v51, %v516_v60 }
 0xdb1   :  { %v524_v62 = vpack.c.bf16 %v2985_v61, %v2985_v61 }
 0xdb3   :  { %526 = vrot.lane.b32.xlu1 %v524_v62, %s2789_s3 }
 0xe25   :  { %v527_v63 = vpop.permute.xlu1 %526 }
 0xe26   :  { %2459 = vmatmul.mubr.msk.bf16.vlgmr.msra.gmra.mrb[12].mxu0 %vm198_vm2, %v527_v63 }
 0xe27   :  { %2471 = vmatpush3.bf16.msra.mxu0 %v2885_v21  ;;  %2474 = vmatprep.mubr.msk.bf16.mxu0 %vm2791_vm1, %v2790_v20 }
 0xe28   :  { %2472 = vmatprep.subr.bf16.mxu0 %v2790_v20 }
 0xe2b   :  { %2473 = vmatpush3.bf16.msra.mxu0 %v2894_v22 }
 0xe2c   :  { %2490 = vmatprep.subr.bf16.mxu0 %v2790_v20 }
 0xef9   :  { %v565_v1 = vpop.f32.mrb[12].mxu0 }
 0xefa   :  { %v571_v2 = vadd.f32 %v565_v1, %v154_v0  ;;  %v2460_v4 = vpop.f32.mrb[13].mxu0 }
 0xefb   :  { %v568_v5 = vpop.f32.mrb[14].mxu0 }
 0xefc   :  { %v2255_v6 = vmul.f32 -1.442695, %v571_v2  ;;  %v2461_v8 = vpop.f32.mrb[15].mxu0 }
 0xefe   :  { %2670 = vpow2.f32 %v2255_v6 }
 0xf08   :  { %v2671_v21 = vpop.eup %2670 }
 0xf09   :  { %v575_v10 = vadd.f32 1.0, %v2671_v21 }
 0xf0b   :  { %2672 = vrcp.f32 %v575_v10 }
 0xf15   :  { %v2673_v12 = vpop.eup %2672 }
 0xf16   :  { %v578_v15 = vmul.f32 2.0, %v2673_v12  ;;  %v580_v14 = vmul.f32 %v2673_v12, %v512_v58 }
 0xf18   :  { %v2256_v16 = vadd.f32 -1.0, %v578_v15  ;;  %v3062_v15 = vld [vmem:[%s3404_s5] sm:$0xff]  }
 0xf1a   :  { %582 = vrot.lane.b32.xlu0 %v2256_v16, %s2788_s1  ;;  %v3069_v16 = vld [vmem:[%s3404_s5 + $0x8] sm:$0xff]  }
 0xf8c   :  { %v583_v22 = vpop.permute.xlu0 %582 }
 0xf8d   :  { %v585_v17 = vmul.f32 %v2673_v12, %v583_v22 }
 0xf8f   :  { %587 = vrot.lane.b32.xlu1 %v585_v17, %s2789_s3 }
 0xf93   :  { %195 = vrot.lane.b32.xlu1 %v2904_v25, %s2789_s3  ;;  %v2632_v25 = vld [vmem:[%s3402_s4] sm:$0xff]  }
 0xf94   :  { %2478 = vmatprep.subr.bf16.mxu1 %v2632_v25 }
 0xf97   :  { %364 = vrot.lane.b32.xlu1 %v2947_v9, %s2789_s3 }
0x1001   :  { %v588_v18 = vpop.permute.xlu1 %587 }
0x1002   :  { %v3005_v19 = vadd.f32 %v588_v18, %v580_v14 }
0x1004   :  { %2674 = vtanh.f32 %v3005_v19 }
0x1005   :  { %v196_v23 = vpop.permute.xlu1 %195 }
0x1006   :  { %199 = vst.msk [vmem:[#allocation2] sm:$0xff] %vm198_vm2, %v196_v23 }
0x1009   :  { %v365_v24 = vpop.permute.xlu1 %364 }
0x100a   :  { %367 = vst.msk [vmem:[#allocation2 + $0x10] sm:$0xff] %vm198_vm2, %v365_v24 }
0x100d   :  { %v758_v31 = vld [vmem:[#allocation2] sm:$0xff] }
0x100e   :  { %v2675_v26 = vpop.eup %2674 }
0x100f   :  { %593 = vrot.lane.b32.xlu0 %v2675_v26, %s2788_s1 }
0x1011   :  { %v760_v35 = vld [vmem:[#allocation2 + $0x10] sm:$0xff] }
0x1013   :  { %286 = vrot.lane.b32.xlu0 %v2920_v47, %s2789_s3 }
0x1017   :  { %442 = vrot.lane.b32.xlu0 %v2970_v38, %s2789_s3 }
0x1081   :  { %v594_v9 = vpop.permute.xlu0 %593 }
0x1082   :  { %v3018_v27 = vmul.f32 %v2673_v12, %v594_v9 }
0x1084   :  { %v602_v28 = vpack.c.bf16 %v3018_v27, %v3018_v27 }
0x1085   :  { %v287_v29 = vpop.permute.xlu0 %286 }
0x1086   :  { %289 = vst.msk [vmem:[#allocation2 + $0x8] sm:$0xff] %vm198_vm2, %v287_v29  ;;  %604 = vrot.lane.b32.xlu1 %v602_v28, %s2789_s3 }
0x1089   :  { %v443_v47 = vpop.permute.xlu0 %442 }
0x108a   :  { %445 = vst.msk [vmem:[#allocation2 + $0x18] sm:$0xff] %vm198_vm2, %v443_v47 }
0x108d   :  { %v759_v30 = vld [vmem:[#allocation2 + $0x8] sm:$0xff] }
0x108e   :  { %v766_v7 = vpack.c.bf16 %v759_v30, %v758_v31 }
0x1091   :  { %v761_v34 = vld [vmem:[#allocation2 + $0x18] sm:$0xff] }
0x1092   :  { %v767_v36 = vpack.c.bf16 %v761_v34, %v760_v35 }
0x10f8   :  { %v605_v33 = vpop.permute.xlu1 %604 }
0x10f9   :  { %2467 = vmatmul.mubr.msk.bf16.vlgmr.msra.gmra.mrb[12].mxu1 %vm198_vm2, %v605_v33 }
0x10fa   :  { %2479 = vmatpush3.bf16.msra.mxu1 %v2632_v25  ;;  %2482 = vmatprep.mubr.msk.bf16.mxu1 %vm198_vm2, %v766_v7  ;;  %v162_v25 = vadd.f32 %v2954_v13, %v2872_v3 }
0x10fb   :  { %2480 = vmatprep.subr.bf16.mxu1 %v2633_v32 }
0x10fe   :  { %2481 = vmatpush3.bf16.msra.mxu1 %v2633_v32 }
0x10ff   :  { %2506 = vmatprep.subr.bf16.mxu1 %v2790_v20 }
0x1101   :  { %2483 = vmatmul.mubr.msk.bf16.vlgmr.msra.gmra.mrb[16].mxu1 %vm198_vm2, %v767_v36 }
0x1102   :  { %2507 = vmatpush3.bf16.msra.mxu1 %v3062_v15 }
0x1103   :  { %2508 = vmatprep.subr.bf16.mxu1 %v2790_v20 }
0x1106   :  { %2509 = vmatpush3.bf16.msra.mxu1 %v3069_v16 }
0x1107   :  { %2522 = vmatprep.subr.bf16.mxu1 %v2790_v20 }
0x11cc   :  { %v643_v38 = vpop.f32.mrb[12].mxu1 }
0x11cd   :  { %v649_v39 = vadd.f32 %v643_v38, %v159_v37  ;;  %v2468_v40 = vpop.f32.mrb[13].mxu1 }
0x11ce   :  { %v646_v41 = vpop.f32.mrb[14].mxu1 }
0x11cf   :  { %v2258_v42 = vmul.f32 -1.442695, %v649_v39  ;;  %v2469_v43 = vpop.f32.mrb[15].mxu1 }
0x11d1   :  { %2676 = vpow2.f32 %v2258_v42 }
0x11d4   :  { %v3039_v45 = vpop.f32.mrb[16].mxu1 }
0x11d5   :  { %v839_v46 = vpop.f32.mrb[17].mxu1 }
0x11d6   :  { %v840_v48 = vadd.f32 %v3037_v44, %v839_v46  ;;  %v3042_v49 = vpop.f32.mrb[18].mxu1 }
0x11d7   :  { %v3044_v11 = vpop.f32.mrb[19].mxu1 }
0x11d8   :  { %v2270_v50 = vmul.f32 -1.442695, %v840_v48  ;;  %v843_v31 = vadd.f32 %v3037_v44, %v3044_v11 }
0x11da   :  { %2678 = vpow2.f32 %v2270_v50 }
0x11db   :  { %v2677_v51 = vpop.eup %2676 }
0x11dc   :  { %v653_v52 = vadd.f32 1.0, %v2677_v51 }
0x11de   :  { %2680 = vrcp.f32 %v653_v52 }
0x11e4   :  { %v2679_v53 = vpop.eup %2678 }
0x11e5   :  { %v877_v54 = vadd.f32 1.0, %v2679_v53 }
0x11e7   :  { %2682 = vrcp.f32 %v877_v54 }
0x11e8   :  { %v2681_v55 = vpop.eup %2680 }
0x11e9   :  { %v656_v56 = vmul.f32 2.0, %v2681_v55  ;;  %v658_v2 = vmul.f32 %v2681_v55, %v3005_v19 }
0x11eb   :  { %v2259_v57 = vadd.f32 -1.0, %v656_v56 }
0x11ed   :  { %660 = vrot.lane.b32.xlu0 %v2259_v57, %s2788_s1 }
0x11f1   :  { %v2683_v58 = vpop.eup %2682 }
0x11f2   :  { %v880_v59 = vmul.f32 2.0, %v2683_v58  ;;  %v882_v6 = vmul.f32 0.0, %v2683_v58 }
0x11f4   :  { %v2271_v60 = vadd.f32 -1.0, %v880_v59 }
0x11f6   :  { %884 = vrot.lane.b32.xlu1 %v2271_v60, %s2788_s1 }
0x125f   :  { %v661_v62 = vpop.permute.xlu0 %660 }
0x1260   :  { %v663_v63 = vmul.f32 %v2681_v55, %v661_v62 }
0x1262   :  { %665 = vrot.lane.b32.xlu0 %v663_v63, %s2789_s3 }
0x1268   :  { %v885_v0 = vpop.permute.xlu1 %884 }
0x1269   :  { %v887_v1 = vmul.f32 %v2683_v58, %v885_v0 }
0x126b   :  { %889 = vrot.lane.b32.xlu1 %v887_v1, %s2789_s3 }
0x12d4   :  { %v666_v4 = vpop.permute.xlu0 %665 }
0x12d5   :  { %v3051_v5 = vadd.f32 %v666_v4, %v658_v2 }
0x12d7   :  { %2684 = vtanh.f32 %v3051_v5 }
0x12dd   :  { %v890_v8 = vpop.permute.xlu1 %889 }
0x12de   :  { %v3054_v21 = vadd.f32 %v890_v8, %v882_v6  ;;  %v848_v6 = vadd.f32 %v3039_v45, %v3037_v44 }
0x12e0   :  { %2686 = vtanh.f32 %v3054_v21 }
0x12e1   :  { %v2685_v10 = vpop.eup %2684 }
0x12e2   :  { %671 = vrot.lane.b32.xlu0 %v2685_v10, %s2788_s1 }
0x12ea   :  { %v2687_v12 = vpop.eup %2686 }
0x12eb   :  { %895 = vrot.lane.b32.xlu1 %v2687_v12, %s2788_s1 }
0x1354   :  { %v672_v22 = vpop.permute.xlu0 %671 }
0x1355   :  { %v3073_v17 = vmul.f32 %v2681_v55, %v672_v22 }
0x1357   :  { %v680_v14 = vpack.c.bf16 %v3073_v17, %v3073_v17 }
0x1359   :  { %682 = vrot.lane.b32.xlu0 %v680_v14, %s2789_s3 }
0x135d   :  { %v896_v18 = vpop.permute.xlu1 %895 }
0x135e   :  { %v3078_v19 = vmul.f32 %v2683_v58, %v896_v18 }
0x1360   :  { %v904_v23 = vpack.c.bf16 %v3078_v19, %v3078_v19 }
0x1362   :  { %906 = vrot.lane.b32.xlu1 %v904_v23, %s2789_s3 }
0x13cb   :  { %v683_v24 = vpop.permute.xlu0 %682 }
0x13cc   :  { %2475 = vmatmul.mubr.msk.bf16.vlgmr.msra.gmra.mrb[16].mxu0 %vm198_vm2, %v683_v24 }
0x13cd   :  { %2491 = vmatpush3.bf16.msra.mxu0 %v3062_v15  ;;  %2494 = vmatprep.mubr.msk.bf16.mxu0 %vm2791_vm1, %v2790_v20 }
0x13ce   :  { %2492 = vmatprep.subr.bf16.mxu0 %v2790_v20 }
0x13d1   :  { %2493 = vmatpush3.bf16.msra.mxu0 %v3069_v16 }
0x13d2   :  { %2498 = vmatprep.subr.bf16.mxu0 %v2790_v20 }
0x13d4   :  { %v907_v26 = vpop.permute.xlu1 %906 }
0x13d5   :  { %2495 = vmatmul.mubr.msk.bf16.vlgmr.msra.gmra.mrb[20].mxu0 %vm198_vm2, %v907_v26 }
0x13d6   :  { %2499 = vmatpush3.bf16.msra.mxu0 %v3062_v15  ;;  %2502 = vmatprep.mubr.msk.bf16.mxu0 %vm2791_vm1, %v2790_v20 }
0x13d7   :  { %2500 = vmatprep.subr.bf16.mxu0 %v2790_v20 }
0x13da   :  { %2501 = vmatpush3.bf16.msra.mxu0 %v3069_v16 }
0x13db   :  { %2514 = vmatprep.subr.bf16.mxu0 %v2790_v20 }
0x149f   :  { %v721_v9 = vpop.f32.mrb[16].mxu0 }
0x14a0   :  { %v727_v28 = vadd.f32 %v721_v9, %v162_v25  ;;  %v2476_v29 = vpop.f32.mrb[17].mxu0 }
0x14a1   :  { %v724_v47 = vpop.f32.mrb[18].mxu0 }
0x14a2   :  { %v2477_v30 = vpop.f32.mrb[19].mxu0  ;;  %v2261_v42 = vmul.f32 -1.442695, %v727_v28 }
0x14a8   :  { %v957_v32 = vpop.f32.mrb[20].mxu0 }
0x14a9   :  { %v963_v33 = vadd.f32 %v957_v32, %v843_v31  ;;  %v2496_v7 = vpop.f32.mrb[21].mxu0 }
0x14aa   :  { %v960_v34 = vpop.f32.mrb[22].mxu0 }
0x14ab   :  { %v2275_v35 = vmul.f32 -1.442695, %v963_v33  ;;  %v2497_v36 = vpop.f32.mrb[23].mxu0 }
0x14ad   :  { %2688 = vpow2.f32 %v2275_v35 }
0x14b7   :  { %v2689_v37 = vpop.eup %2688 }
0x14b8   :  { %v967_v38 = vadd.f32 1.0, %v2689_v37 }
0x14ba   :  { %2690 = vrcp.f32 %v967_v38 }
0x14bb   :  { %2692 = vpow2.f32 %v2261_v42  ;;  %v851_v42 = vadd.f32 %v3042_v49, %v3037_v44 }
0x14c4   :  { %v2691_v39 = vpop.eup %2690 }
0x14c5   :  { %v970_v3 = vmul.f32 2.0, %v2691_v39  ;;  %v2693_v43 = vpop.eup %2692  ;;  %v972_v48 = vmul.f32 %v2691_v39, %v3054_v21 }
0x14c6   :  { %v731_v46 = vadd.f32 1.0, %v2693_v43 }
0x14c7   :  { %v2276_v13 = vadd.f32 -1.0, %v970_v3 }
0x14c8   :  { %2694 = vrcp.f32 %v731_v46 }
0x14c9   :  { %974 = vrot.lane.b32.xlu0 %v2276_v13, %s2788_s1 }
0x14d2   :  { %v2695_v51 = vpop.eup %2694 }
0x14d3   :  { %v734_v52 = vmul.f32 2.0, %v2695_v51  ;;  %v736_v62 = vmul.f32 %v2695_v51, %v3051_v5 }
0x14d5   :  { %v2262_v54 = vadd.f32 -1.0, %v734_v52 }
0x153b   :  { %v975_v40 = vpop.permute.xlu0 %974 }
0x153c   :  { %v977_v41 = vmul.f32 %v2691_v39, %v975_v40 }
0x153e   :  { %979 = vrot.lane.b32.xlu1 %v977_v41, %s2789_s3 }
0x15b0   :  { %v980_v11 = vpop.permute.xlu1 %979 }
0x15b1   :  { %v982_v50 = vadd.f32 %v980_v11, %v972_v48 }
0x15b3   :  { %2696 = vtanh.f32 %v982_v50 }
0x15bd   :  { %v2697_v53 = vpop.eup %2696 }
0x15be   :  { %985 = vrot.lane.b32.xlu0 %v2697_v53, %s2788_s1 }
0x15c2   :  { %738 = vrot.lane.b32.xlu0 %v2262_v54, %s2788_s1 }
0x1630   :  { %v986_v55 = vpop.permute.xlu0 %985 }
0x1631   :  { %v3106_v56 = vmul.f32 %v2691_v39, %v986_v55 }
0x1633   :  { %v994_v57 = vpack.c.bf16 %v3106_v56, %v3106_v56 }
0x1634   :  { %v739_v58 = vpop.permute.xlu0 %738 }
0x1635   :  { %v741_v59 = vmul.f32 %v2695_v51, %v739_v58  ;;  %996 = vrot.lane.b32.xlu1 %v994_v57, %s2789_s3 }
0x1637   :  { %743 = vrot.lane.b32.xlu0 %v741_v59, %s2789_s3 }
0x16a7   :  { %v997_v60 = vpop.permute.xlu1 %996 }
0x16a8   :  { %2503 = vmatmul.mubr.msk.bf16.vlgmr.msra.gmra.mrb[24].mxu0 %vm198_vm2, %v997_v60 }
0x16a9   :  { %v744_v63 = vpop.permute.xlu0 %743  ;;  %2515 = vmatpush3.bf16.msra.mxu0 %v3062_v15  ;;  %2518 = vmatprep.mubr.msk.bf16.mxu0 %vm2791_vm1, %v2790_v20 }
0x16aa   :  { %v746_v0 = vadd.f32 %v744_v63, %v736_v62  ;;  %2516 = vmatprep.subr.bf16.mxu0 %v2790_v20 }
0x16ac   :  { %2698 = vtanh.f32 %v746_v0 }
0x16ad   :  { %2517 = vmatpush3.bf16.msra.mxu0 %v3069_v16 }
0x16ae   :  { %2530 = vmatprep.subr.bf16.mxu0 %v2790_v20 }
0x16b6   :  { %v2699_v1 = vpop.eup %2698 }
0x16b7   :  { %749 = vrot.lane.b32.xlu0 %v2699_v1, %s2788_s1 }
0x16bb   :  { %520 = vrot.lane.b32.xlu0 %v2985_v61, %s2789_s3 }
0x16bf   :  { %676 = vrot.lane.b32.xlu0 %v3073_v17, %s2789_s3 }
0x1729   :  { %v750_v2 = vpop.permute.xlu0 %749 }
0x172a   :  { %v752_v47 = vmul.f32 %v2695_v51, %v750_v2 }
0x172d   :  { %v521_v4 = vpop.permute.xlu0 %520 }
0x172e   :  { %523 = vst.msk [vmem:[#allocation2 + $0x20] sm:$0xff] %vm198_vm2, %v521_v4 }
0x1731   :  { %v677_v5 = vpop.permute.xlu0 %676 }
0x1732   :  { %679 = vst.msk [vmem:[#allocation2 + $0x30] sm:$0xff] %vm198_vm2, %v677_v5 }
0x1735   :  { %v762_v34 = vld [vmem:[#allocation2 + $0x20] sm:$0xff] }
0x1739   :  { %v764_v36 = vld [vmem:[#allocation2 + $0x30] sm:$0xff] }
0x177b   :  { %v1035_v8 = vpop.f32.mrb[24].mxu0 }
0x177c   :  { %v1041_v21 = vadd.f32 %v1035_v8, %v848_v6  ;;  %v2504_v10 = vpop.f32.mrb[25].mxu0 }
0x177d   :  { %v1038_v12 = vpop.f32.mrb[26].mxu0 }
0x177e   :  { %v2278_v22 = vmul.f32 -1.442695, %v1041_v21  ;;  %v2505_v14 = vpop.f32.mrb[27].mxu0 }
0x1780   :  { %2700 = vpow2.f32 %v2278_v22 }
0x178a   :  { %v2701_v61 = vpop.eup %2700 }
0x178b   :  { %v1045_v18 = vadd.f32 1.0, %v2701_v61 }
0x178d   :  { %2702 = vrcp.f32 %v1045_v18 }
0x1797   :  { %v2703_v17 = vpop.eup %2702 }
0x1798   :  { %v1048_v23 = vmul.f32 2.0, %v2703_v17  ;;  %v1050_v45 = vmul.f32 %v2703_v17, %v982_v50 }
0x179a   :  { %v2279_v24 = vadd.f32 -1.0, %v1048_v23 }
0x179c   :  { %1052 = vrot.lane.b32.xlu1 %v2279_v24, %s2788_s1 }
0x180e   :  { %v1053_v26 = vpop.permute.xlu1 %1052 }
0x180f   :  { %v1055_v25 = vmul.f32 %v2703_v17, %v1053_v26 }
0x1811   :  { %1057 = vrot.lane.b32.xlu1 %v1055_v25, %s2789_s3 }
0x1883   :  { %v1058_v9 = vpop.permute.xlu1 %1057 }
0x1884   :  { %v1060_v28 = vadd.f32 %v1058_v9, %v1050_v45 }
0x1886   :  { %2704 = vtanh.f32 %v1060_v28 }
0x1890   :  { %v2705_v29 = vpop.eup %2704 }
0x1891   :  { %1063 = vrot.lane.b32.xlu1 %v2705_v29, %s2788_s1 }
0x1895   :  { %598 = vrot.lane.b32.xlu1 %v3018_v27, %s2789_s3 }
0x1899   :  { %754 = vrot.lane.b32.xlu1 %v752_v47, %s2789_s3 }
0x1903   :  { %v1064_v30 = vpop.permute.xlu1 %1063 }
0x1904   :  { %v3135_v31 = vmul.f32 %v2703_v17, %v1064_v30 }
0x1906   :  { %v1072_v32 = vpack.c.bf16 %v3135_v31, %v3135_v31 }
0x1907   :  { %v599_v33 = vpop.permute.xlu1 %598 }
0x1908   :  { %601 = vst.msk [vmem:[#allocation2 + $0x28] sm:$0xff] %vm198_vm2, %v599_v33  ;;  %1074 = vrot.lane.b32.xlu0 %v1072_v32, %s2789_s3 }
0x190b   :  { %v755_v7 = vpop.permute.xlu1 %754 }
0x190c   :  { %757 = vst.msk [vmem:[#allocation2 + $0x38] sm:$0xff] %vm198_vm2, %v755_v7 }
0x190f   :  { %v763_v35 = vld [vmem:[#allocation2 + $0x28] sm:$0xff] }
0x1910   :  { %v768_v27 = vpack.c.bf16 %v763_v35, %v762_v34 }
0x1912   :  { %2486 = vmatprep.mubr.msk.bf16.mxu1 %vm198_vm2, %v768_v27 }
0x1913   :  { %v765_v37 = vld [vmem:[#allocation2 + $0x38] sm:$0xff] }
0x1914   :  { %v769_v38 = vpack.c.bf16 %v765_v37, %v764_v36 }
0x1916   :  { %2487 = vmatmul.mubr.msk.bf16.gmra.mrb[20].mxu1 %vm198_vm2, %v769_v38 }
0x1917   :  { %2510 = vmatprep.mubr.msk.bf16.mxu1 %vm2791_vm1, %v2790_v20 }
0x197a   :  { %v1075_v39 = vpop.permute.xlu0 %1074 }
0x197b   :  { %2511 = vmatmul.mubr.msk.bf16.vlgmr.msra.gmra.mrb[24].mxu1 %vm198_vm2, %v1075_v39 }
0x197c   :  { %2523 = vmatpush3.bf16.msra.mxu1 %v3062_v15  ;;  %2526 = vmatprep.mubr.msk.bf16.mxu1 %vm2791_vm1, %v2790_v20 }
0x197d   :  { %2524 = vmatprep.subr.bf16.mxu1 %v2790_v20 }
0x1980   :  { %2525 = vmatpush3.bf16.msra.mxu1 %v3069_v16 }
0x1981   :  { %2538 = vmatprep.subr.bf16.mxu1 %v2790_v20 }
0x19e9   :  { %v3153_v3 = vpop.f32.mrb[20].mxu1 }
0x19ea   :  { %v855_v13 = vpop.f32.mrb[21].mxu1 }
0x19eb   :  { %v3155_v40 = vpop.f32.mrb[22].mxu1  ;;  %v856_v5 = vadd.f32 %v3037_v44, %v855_v13 }
0x19ec   :  { %v3157_v41 = vpop.f32.mrb[23].mxu1 }
0x19ed   :  { %v859_v33 = vadd.f32 %v3037_v44, %v3157_v41 }
0x1a4e   :  { %v1113_v43 = vpop.f32.mrb[24].mxu1 }
0x1a4f   :  { %v1119_v46 = vadd.f32 %v1113_v43, %v851_v42  ;;  %v2512_v48 = vpop.f32.mrb[25].mxu1 }
0x1a50   :  { %v1116_v11 = vpop.f32.mrb[26].mxu1 }
0x1a51   :  { %v2281_v50 = vmul.f32 -1.442695, %v1119_v46  ;;  %v2513_v51 = vpop.f32.mrb[27].mxu1 }
0x1a53   :  { %2706 = vpow2.f32 %v2281_v50 }
0x1a5d   :  { %v2707_v52 = vpop.eup %2706 }
0x1a5e   :  { %v1123_v53 = vadd.f32 1.0, %v2707_v52 }
0x1a60   :  { %2708 = vrcp.f32 %v1123_v53 }
0x1a6a   :  { %v2709_v54 = vpop.eup %2708 }
0x1a6b   :  { %v1126_v55 = vmul.f32 2.0, %v2709_v54  ;;  %v1128_v49 = vmul.f32 %v2709_v54, %v1060_v28 }
0x1a6d   :  { %v2282_v57 = vadd.f32 -1.0, %v1126_v55 }
0x1a6f   :  { %1130 = vrot.lane.b32.xlu1 %v2282_v57, %s2788_s1 }
0x1ae1   :  { %v1131_v58 = vpop.permute.xlu1 %1130 }
0x1ae2   :  { %v1133_v59 = vmul.f32 %v2709_v54, %v1131_v58  ;;  %v2637_v58 = vld [vmem:[%s3405_s7 + $0x8] sm:$0xff]  }
0x1ae4   :  { %1135 = vrot.lane.b32.xlu0 %v1133_v59, %s2789_s3 }
0x1b56   :  { %v1136_v60 = vpop.permute.xlu0 %1135 }
0x1b57   :  { %v1138_v62 = vadd.f32 %v1136_v60, %v1128_v49 }
0x1b59   :  { %2710 = vtanh.f32 %v1138_v62 }
0x1b63   :  { %v2711_v63 = vpop.eup %2710 }
0x1b64   :  { %1141 = vrot.lane.b32.xlu1 %v2711_v63, %s2788_s1 }
0x1bd6   :  { %v1142_v0 = vpop.permute.xlu1 %1141 }
0x1bd7   :  { %v3164_v1 = vmul.f32 %v2709_v54, %v1142_v0  ;;  %v864_v0 = vadd.f32 %v3153_v3, %v3037_v44 }
0x1bd9   :  { %v1150_v2 = vpack.c.bf16 %v3164_v1, %v3164_v1 }
0x1bdb   :  { %1152 = vrot.lane.b32.xlu0 %v1150_v2, %s2789_s3 }
0x1c4d   :  { %v1153_v4 = vpop.permute.xlu0 %1152 }
0x1c4e   :  { %2519 = vmatmul.mubr.msk.bf16.vlgmr.msra.gmra.mrb[28].mxu0 %vm198_vm2, %v1153_v4 }
0x1c4f   :  { %2531 = vmatpush3.bf16.msra.mxu0 %v3062_v15  ;;  %2534 = vmatprep.mubr.msk.bf16.mxu0 %vm2791_vm1, %v2790_v20 }
0x1c50   :  { %2532 = vmatprep.subr.bf16.mxu0 %v2790_v20 }
0x1c53   :  { %2533 = vmatpush3.bf16.msra.mxu0 %v3069_v16 }
0x1d21   :  { %v1191_v6 = vpop.f32.mrb[28].mxu0 }
0x1d22   :  { %v1197_v8 = vadd.f32 %v1191_v6, %v856_v5  ;;  %v2520_v21 = vpop.f32.mrb[29].mxu0 }
0x1d23   :  { %v1194_v10 = vpop.f32.mrb[30].mxu0  ;;  %v3231_v21 = vld [vmem:[%s3406_s9] ss:$0 sm:$0xff] }
0x1d24   :  { %v2284_v12 = vmul.f32 -1.442695, %v1197_v8  ;;  %v2521_v22 = vpop.f32.mrb[31].mxu0 }
0x1d26   :  { %2712 = vpow2.f32 %v2284_v12 }
0x1d30   :  { %v2713_v14 = vpop.eup %2712 }
0x1d31   :  { %v1201_v61 = vadd.f32 1.0, %v2713_v14 }
0x1d33   :  { %2714 = vrcp.f32 %v1201_v61 }
0x1d3d   :  { %v2715_v18 = vpop.eup %2714 }
0x1d3e   :  { %v1204_v17 = vmul.f32 2.0, %v2715_v18  ;;  %v1206_v25 = vmul.f32 %v2715_v18, %v1138_v62 }
0x1d40   :  { %v2285_v23 = vadd.f32 -1.0, %v1204_v17 }
0x1d42   :  { %1208 = vrot.lane.b32.xlu1 %v2285_v23, %s2788_s1 }
0x1db4   :  { %v1209_v24 = vpop.permute.xlu1 %1208 }
0x1db5   :  { %v1211_v26 = vmul.f32 %v2715_v18, %v1209_v24 }
0x1db7   :  { %1213 = vrot.lane.b32.xlu0 %v1211_v26, %s2789_s3 }
0x1e29   :  { %v1214_v45 = vpop.permute.xlu0 %1213 }
0x1e2a   :  { %v1216_v9 = vadd.f32 %v1214_v45, %v1206_v25 }
0x1e2c   :  { %2716 = vtanh.f32 %v1216_v9 }
0x1e36   :  { %v2717_v28 = vpop.eup %2716 }
0x1e37   :  { %1219 = vrot.lane.b32.xlu1 %v2717_v28, %s2788_s1 }
0x1ea9   :  { %v1220_v29 = vpop.permute.xlu1 %1219 }
0x1eaa   :  { %v3179_v47 = vmul.f32 %v2715_v18, %v1220_v29 }
0x1eac   :  { %v1228_v30 = vpack.c.bf16 %v3179_v47, %v3179_v47 }
0x1eae   :  { %1230 = vrot.lane.b32.xlu0 %v1228_v30, %s2789_s3 }
0x1f20   :  { %v1231_v32 = vpop.permute.xlu0 %1230 }
0x1f21   :  { %2527 = vmatmul.mubr.msk.bf16.vlgmr.msra.gmra.mrb[28].mxu1 %vm198_vm2, %v1231_v32 }
0x1f22   :  { %2539 = vmatpush3.bf16.msra.mxu1 %v3062_v15  ;;  %2542 = vmatprep.mubr.msk.bf16.mxu1 %vm2791_vm1, %v2790_v20 }
0x1f23   :  { %2540 = vmatprep.subr.bf16.mxu1 %v2790_v20 }
0x1f26   :  { %2541 = vmatpush3.bf16.msra.mxu1 %v3069_v16 }
0x1f27   :  { %2558 = vmatprep.subr.bf16.mxu1 %v2790_v20 }
0x1ff4   :  { %v1269_v7 = vpop.f32.mrb[28].mxu1 }
0x1ff5   :  { %v1275_v34 = vadd.f32 %v1269_v7, %v859_v33  ;;  %v2528_v35 = vpop.f32.mrb[29].mxu1 }
0x1ff6   :  { %v1272_v27 = vpop.f32.mrb[30].mxu1 }
0x1ff7   :  { %v2287_v36 = vmul.f32 -1.442695, %v1275_v34  ;;  %v2529_v37 = vpop.f32.mrb[31].mxu1 }
0x1ff9   :  { %2718 = vpow2.f32 %v2287_v36 }
0x2003   :  { %v2719_v15 = vpop.eup %2718 }
0x2004   :  { %v1279_v38 = vadd.f32 1.0, %v2719_v15 }
0x2006   :  { %2720 = vrcp.f32 %v1279_v38 }
0x2010   :  { %v2721_v39 = vpop.eup %2720 }
0x2011   :  { %v1282_v13 = vmul.f32 2.0, %v2721_v39  ;;  %v1284_v41 = vmul.f32 %v2721_v39, %v1216_v9 }
0x2013   :  { %v2288_v42 = vadd.f32 -1.0, %v1282_v13  ;;  %v3256_v13 = vld [vmem:[%s3407_s8] sm:$0xff]  }
0x2015   :  { %1286 = vrot.lane.b32.xlu1 %v2288_v42, %s2788_s1  ;;  %v3263_v42 = vld [vmem:[%s3407_s8 + $0x8] sm:$0xff]  }
0x2087   :  { %v1287_v16 = vpop.permute.xlu1 %1286 }
0x2088   :  { %v1289_v43 = vmul.f32 %v2721_v39, %v1287_v16 }
0x208a   :  { %1291 = vrot.lane.b32.xlu0 %v1289_v43, %s2789_s3 }
0x208e   :  { %900 = vrot.lane.b32.xlu0 %v3078_v19, %s2789_s3  ;;  %v2636_v19 = vld [vmem:[%s3405_s7] sm:$0xff]  }
0x208f   :  { %2546 = vmatprep.subr.bf16.mxu0 %v2636_v19 }
0x2092   :  { %1068 = vrot.lane.b32.xlu0 %v3135_v31, %s2789_s3 }
0x20fc   :  { %v1292_v46 = vpop.permute.xlu0 %1291 }
0x20fd   :  { %v3199_v48 = vadd.f32 %v1292_v46, %v1284_v41 }
0x20ff   :  { %2722 = vtanh.f32 %v3199_v48 }
0x2100   :  { %v901_v11 = vpop.permute.xlu0 %900 }
0x2101   :  { %903 = vst.msk [vmem:[#allocation2] sm:$0xff] %vm198_vm2, %v901_v11 }
0x2104   :  { %v1069_v50 = vpop.permute.xlu0 %1068 }
0x2105   :  { %1071 = vst.msk [vmem:[#allocation2 + $0x10] sm:$0xff] %vm198_vm2, %v1069_v50 }
0x2108   :  { %v1462_v57 = vld [vmem:[#allocation2] sm:$0xff] }
0x2109   :  { %v2723_v51 = vpop.eup %2722 }
0x210a   :  { %1297 = vrot.lane.b32.xlu1 %v2723_v51, %s2788_s1 }
0x210c   :  { %v1464_v62 = vld [vmem:[#allocation2 + $0x10] sm:$0xff] }
0x210e   :  { %990 = vrot.lane.b32.xlu1 %v3106_v56, %s2789_s3 }
0x2112   :  { %1146 = vrot.lane.b32.xlu1 %v3164_v1, %s2789_s3 }
0x217c   :  { %v1298_v31 = vpop.permute.xlu1 %1297 }
0x217d   :  { %v3212_v52 = vmul.f32 %v2721_v39, %v1298_v31 }
0x217f   :  { %v1306_v53 = vpack.c.bf16 %v3212_v52, %v3212_v52 }
0x2180   :  { %v991_v54 = vpop.permute.xlu1 %990 }
0x2181   :  { %993 = vst.msk [vmem:[#allocation2 + $0x8] sm:$0xff] %vm198_vm2, %v991_v54  ;;  %1308 = vrot.lane.b32.xlu0 %v1306_v53, %s2789_s3 }
0x2184   :  { %v1147_v56 = vpop.permute.xlu1 %1146 }
0x2185   :  { %1149 = vst.msk [vmem:[#allocation2 + $0x18] sm:$0xff] %vm198_vm2, %v1147_v56 }
0x2188   :  { %v1463_v55 = vld [vmem:[#allocation2 + $0x8] sm:$0xff] }
0x2189   :  { %v1470_v49 = vpack.c.bf16 %v1463_v55, %v1462_v57 }
0x218c   :  { %v1465_v60 = vld [vmem:[#allocation2 + $0x18] sm:$0xff] }
0x218d   :  { %v1471_v63 = vpack.c.bf16 %v1465_v60, %v1464_v62 }
0x21f3   :  { %v1309_v59 = vpop.permute.xlu0 %1308 }
0x21f4   :  { %2535 = vmatmul.mubr.msk.bf16.vlgmr.msra.gmra.mrb[32].mxu0 %vm198_vm2, %v1309_v59 }
0x21f5   :  { %2547 = vmatpush3.bf16.msra.mxu0 %v2636_v19  ;;  %2550 = vmatprep.mubr.msk.bf16.mxu0 %vm198_vm2, %v1470_v49  ;;  %v867_v19 = vadd.f32 %v3155_v40, %v3037_v44 }
0x21f6   :  { %2548 = vmatprep.subr.bf16.mxu0 %v2637_v58 }
0x21f9   :  { %2549 = vmatpush3.bf16.msra.mxu0 %v2637_v58 }
0x21fa   :  { %2574 = vmatprep.subr.bf16.mxu0 %v2790_v20 }
0x21fc   :  { %2551 = vmatmul.mubr.msk.bf16.vlgmr.msra.gmra.mrb[36].mxu0 %vm198_vm2, %v1471_v63 }
0x21fd   :  { %2575 = vmatpush3.bf16.msra.mxu0 %v3256_v13 }
0x21fe   :  { %2576 = vmatprep.subr.bf16.mxu0 %v2790_v20 }
0x2201   :  { %2577 = vmatpush3.bf16.msra.mxu0 %v3263_v42 }
0x2202   :  { %2590 = vmatprep.subr.bf16.mxu0 %v2790_v20 }
0x22c7   :  { %v1347_v1 = vpop.f32.mrb[32].mxu0 }
0x22c8   :  { %v1353_v2 = vadd.f32 %v1347_v1, %v864_v0  ;;  %v2536_v4 = vpop.f32.mrb[33].mxu0 }
0x22c9   :  { %v1350_v5 = vpop.f32.mrb[34].mxu0 }
0x22ca   :  { %v2290_v6 = vmul.f32 -1.442695, %v1353_v2  ;;  %v2537_v8 = vpop.f32.mrb[35].mxu0 }
0x22cc   :  { %2724 = vpow2.f32 %v2290_v6 }
0x22cf   :  { %v3233_v10 = vpop.f32.mrb[36].mxu0 }
0x22d0   :  { %v1543_v12 = vpop.f32.mrb[37].mxu0 }
0x22d1   :  { %v1544_v22 = vadd.f32 %v3231_v21, %v1543_v12  ;;  %v3236_v14 = vpop.f32.mrb[38].mxu0 }
0x22d2   :  { %v3238_v3 = vpop.f32.mrb[39].mxu0 }
0x22d3   :  { %v2302_v61 = vmul.f32 -1.442695, %v1544_v22  ;;  %v1547_v57 = vadd.f32 %v3231_v21, %v3238_v3 }
0x22d5   :  { %2726 = vpow2.f32 %v2302_v61 }
0x22d6   :  { %v2725_v18 = vpop.eup %2724 }
0x22d7   :  { %v1357_v17 = vadd.f32 1.0, %v2725_v18 }
0x22d9   :  { %2728 = vrcp.f32 %v1357_v17 }
0x22df   :  { %v2727_v23 = vpop.eup %2726 }
0x22e0   :  { %v1581_v24 = vadd.f32 1.0, %v2727_v23 }
0x22e2   :  { %2730 = vrcp.f32 %v1581_v24 }
0x22e3   :  { %v2729_v26 = vpop.eup %2728 }
0x22e4   :  { %v1360_v25 = vmul.f32 2.0, %v2729_v26  ;;  %v1362_v34 = vmul.f32 %v2729_v26, %v3199_v48 }
0x22e6   :  { %v2291_v45 = vadd.f32 -1.0, %v1360_v25 }
0x22e8   :  { %1364 = vrot.lane.b32.xlu1 %v2291_v45, %s2788_s1 }
0x22ec   :  { %v2731_v9 = vpop.eup %2730 }
0x22ed   :  { %v1584_v28 = vmul.f32 2.0, %v2731_v9  ;;  %v1586_v36 = vmul.f32 0.0, %v2731_v9 }
0x22ef   :  { %v2303_v29 = vadd.f32 -1.0, %v1584_v28 }
0x22f1   :  { %1588 = vrot.lane.b32.xlu0 %v2303_v29, %s2788_s1 }
0x235a   :  { %v1365_v30 = vpop.permute.xlu1 %1364 }
0x235b   :  { %v1367_v32 = vmul.f32 %v2729_v26, %v1365_v30 }
0x235d   :  { %1369 = vrot.lane.b32.xlu1 %v1367_v32, %s2789_s3 }
0x2363   :  { %v1589_v33 = vpop.permute.xlu0 %1588 }
0x2364   :  { %v1591_v7 = vmul.f32 %v2731_v9, %v1589_v33 }
0x2366   :  { %1593 = vrot.lane.b32.xlu0 %v1591_v7, %s2789_s3 }
0x23cf   :  { %v1370_v35 = vpop.permute.xlu1 %1369 }
0x23d0   :  { %v3245_v27 = vadd.f32 %v1370_v35, %v1362_v34 }
0x23d2   :  { %2732 = vtanh.f32 %v3245_v27 }
0x23d8   :  { %v1594_v37 = vpop.permute.xlu0 %1593 }
0x23d9   :  { %v3248_v15 = vadd.f32 %v1594_v37, %v1586_v36  ;;  %v1552_v36 = vadd.f32 %v3233_v10, %v3231_v21 }
0x23db   :  { %2734 = vtanh.f32 %v3248_v15 }
0x23dc   :  { %v2733_v38 = vpop.eup %2732 }
0x23dd   :  { %1375 = vrot.lane.b32.xlu1 %v2733_v38, %s2788_s1 }
0x23e5   :  { %v2735_v39 = vpop.eup %2734 }
0x23e6   :  { %1599 = vrot.lane.b32.xlu0 %v2735_v39, %s2788_s1 }
0x244f   :  { %v1376_v16 = vpop.permute.xlu1 %1375 }
0x2450   :  { %v3267_v43 = vmul.f32 %v2729_v26, %v1376_v16 }
0x2452   :  { %v1384_v41 = vpack.c.bf16 %v3267_v43, %v3267_v43 }
0x2454   :  { %1386 = vrot.lane.b32.xlu1 %v1384_v41, %s2789_s3 }
0x2458   :  { %v1600_v46 = vpop.permute.xlu0 %1599 }
0x2459   :  { %v1602_v48 = vmul.f32 %v2731_v9, %v1600_v46 }
0x245b   :  { %v1603_v11 = vpack.c.bf16 %v1602_v48, %v1602_v48 }
0x245d   :  { %1605 = vrot.lane.b32.xlu0 %v1603_v11, %s2789_s3 }
0x24c6   :  { %v1387_v50 = vpop.permute.xlu1 %1386 }
0x24c7   :  { %2543 = vmatmul.mubr.msk.bf16.vlgmr.msra.gmra.mrb[32].mxu1 %vm198_vm2, %v1387_v50 }
0x24c8   :  { %2559 = vmatpush3.bf16.msra.mxu1 %v3256_v13  ;;  %2562 = vmatprep.mubr.msk.bf16.mxu1 %vm2791_vm1, %v2790_v20 }
0x24c9   :  { %2560 = vmatprep.subr.bf16.mxu1 %v2790_v20 }
0x24cc   :  { %2561 = vmatpush3.bf16.msra.mxu1 %v3263_v42 }
0x24cd   :  { %2566 = vmatprep.subr.bf16.mxu1 %v2790_v20 }
0x24cf   :  { %v1606_v51 = vpop.permute.xlu0 %1605 }
0x24d0   :  { %2563 = vmatmul.mubr.msk.bf16.vlgmr.msra.gmra.mrb[36].mxu1 %vm198_vm2, %v1606_v51 }
0x24d1   :  { %2567 = vmatpush3.bf16.msra.mxu1 %v3256_v13  ;;  %2570 = vmatprep.mubr.msk.bf16.mxu1 %vm2791_vm1, %v2790_v20 }
0x24d2   :  { %2568 = vmatprep.subr.bf16.mxu1 %v2790_v20 }
0x24d5   :  { %2569 = vmatpush3.bf16.msra.mxu1 %v3263_v42 }
0x24d6   :  { %2582 = vmatprep.subr.bf16.mxu1 %v2790_v20 }
0x259a   :  { %v1425_v31 = vpop.f32.mrb[32].mxu1 }
0x259b   :  { %v1431_v53 = vadd.f32 %v1425_v31, %v867_v19  ;;  %v2544_v54 = vpop.f32.mrb[33].mxu1 }
0x259c   :  { %v1428_v56 = vpop.f32.mrb[34].mxu1 }
0x259d   :  { %v2545_v55 = vpop.f32.mrb[35].mxu1  ;;  %v2293_v6 = vmul.f32 -1.442695, %v1431_v53 }
0x25a3   :  { %v1656_v58 = vpop.f32.mrb[36].mxu1 }
0x25a4   :  { %v1662_v59 = vadd.f32 %v1656_v58, %v1547_v57  ;;  %v2564_v49 = vpop.f32.mrb[37].mxu1 }
0x25a5   :  { %v1659_v60 = vpop.f32.mrb[38].mxu1 }
0x25a6   :  { %v2307_v62 = vmul.f32 -1.442695, %v1662_v59  ;;  %v2565_v63 = vpop.f32.mrb[39].mxu1 }
0x25a8   :  { %2736 = vpow2.f32 %v2307_v62 }
0x25b2   :  { %v2737_v0 = vpop.eup %2736 }
0x25b3   :  { %v1666_v1 = vadd.f32 1.0, %v2737_v0 }
0x25b5   :  { %2738 = vrcp.f32 %v1666_v1 }
0x25b6   :  { %2740 = vpow2.f32 %v2293_v6 }
0x25bf   :  { %v2739_v2 = vpop.eup %2738 }
0x25c0   :  { %v1669_v44 = vmul.f32 2.0, %v2739_v2  ;;  %v2741_v8 = vpop.eup %2740  ;;  %v1671_v22 = vmul.f32 %v2739_v2, %v3248_v15 }
0x25c1   :  { %v1435_v12 = vadd.f32 1.0, %v2741_v8 }
0x25c2   :  { %v2308_v40 = vadd.f32 -1.0, %v1669_v44 }
0x25c3   :  { %2742 = vrcp.f32 %v1435_v12 }
0x25c4   :  { %1673 = vrot.lane.b32.xlu1 %v2308_v40, %s2788_s1 }
0x25cd   :  { %v2743_v18 = vpop.eup %2742 }
0x25ce   :  { %v1438_v17 = vmul.f32 2.0, %v2743_v18  ;;  %v1440_v30 = vmul.f32 %v2743_v18, %v3245_v27 }
0x25d0   :  { %v2294_v24 = vadd.f32 -1.0, %v1438_v17 }
0x2636   :  { %v1674_v4 = vpop.permute.xlu1 %1673 }
0x2637   :  { %v1676_v5 = vmul.f32 %v2739_v2, %v1674_v4 }
0x2639   :  { %1678 = vrot.lane.b32.xlu0 %v1676_v5, %s2789_s3  ;;  %v1555_v5 = vadd.f32 %v3236_v14, %v3231_v21 }
0x26ab   :  { %v1679_v3 = vpop.permute.xlu0 %1678 }
0x26ac   :  { %v1681_v61 = vadd.f32 %v1679_v3, %v1671_v22 }
0x26ae   :  { %2744 = vtanh.f32 %v1681_v61 }
0x26b8   :  { %v2745_v23 = vpop.eup %2744 }
0x26b9   :  { %1684 = vrot.lane.b32.xlu1 %v2745_v23, %s2788_s1 }
0x26bd   :  { %1442 = vrot.lane.b32.xlu1 %v2294_v24, %s2788_s1 }
0x272b   :  { %v1685_v26 = vpop.permute.xlu1 %1684 }
0x272c   :  { %v1687_v25 = vmul.f32 %v2739_v2, %v1685_v26 }
0x272e   :  { %v1688_v45 = vpack.c.bf16 %v1687_v25, %v1687_v25 }
0x272f   :  { %v1443_v9 = vpop.permute.xlu1 %1442 }
0x2730   :  { %v1445_v28 = vmul.f32 %v2743_v18, %v1443_v9  ;;  %1690 = vrot.lane.b32.xlu0 %v1688_v45, %s2789_s3 }
0x2732   :  { %1447 = vrot.lane.b32.xlu1 %v1445_v28, %s2789_s3 }
0x27a2   :  { %v1691_v29 = vpop.permute.xlu0 %1690 }
0x27a3   :  { %2571 = vmatmul.mubr.msk.bf16.vlgmr.msra.gmra.mrb[40].mxu1 %vm198_vm2, %v1691_v29 }
0x27a4   :  { %v1448_v32 = vpop.permute.xlu1 %1447  ;;  %2583 = vmatpush3.bf16.msra.mxu1 %v3256_v13  ;;  %2586 = vmatprep.mubr.msk.bf16.mxu1 %vm2791_vm1, %v2790_v20 }
0x27a5   :  { %v1450_v33 = vadd.f32 %v1448_v32, %v1440_v30  ;;  %2584 = vmatprep.subr.bf16.mxu1 %v2790_v20 }
0x27a7   :  { %2746 = vtanh.f32 %v1450_v33 }
0x27a8   :  { %2585 = vmatpush3.bf16.msra.mxu1 %v3263_v42 }
0x27a9   :  { %2598 = vmatprep.subr.bf16.mxu1 %v2790_v20 }
0x27b1   :  { %v2747_v7 = vpop.eup %2746 }
0x27b2   :  { %1453 = vrot.lane.b32.xlu1 %v2747_v7, %s2788_s1 }
0x27b6   :  { %1224 = vrot.lane.b32.xlu1 %v3179_v47, %s2789_s3 }
0x27ba   :  { %1380 = vrot.lane.b32.xlu1 %v3267_v43, %s2789_s3 }
0x2824   :  { %v1454_v34 = vpop.permute.xlu1 %1453 }
0x2825   :  { %v1456_v54 = vmul.f32 %v2743_v18, %v1454_v34 }
0x2828   :  { %v1225_v35 = vpop.permute.xlu1 %1224 }
0x2829   :  { %1227 = vst.msk [vmem:[#allocation2 + $0x20] sm:$0xff] %vm198_vm2, %v1225_v35 }
0x282c   :  { %v1381_v27 = vpop.permute.xlu1 %1380 }
0x282d   :  { %1383 = vst.msk [vmem:[#allocation2 + $0x30] sm:$0xff] %vm198_vm2, %v1381_v27 }
0x2830   :  { %v1466_v49 = vld [vmem:[#allocation2 + $0x20] sm:$0xff] }
0x2876   :  { %v1729_v37 = vpop.f32.mrb[40].mxu1 }
0x2877   :  { %v1735_v15 = vadd.f32 %v1729_v37, %v1552_v36  ;;  %v2572_v38 = vpop.f32.mrb[41].mxu1 }
0x2878   :  { %v1732_v39 = vpop.f32.mrb[42].mxu1 }
0x2879   :  { %v2310_v16 = vmul.f32 -1.442695, %v1735_v15  ;;  %v2573_v41 = vpop.f32.mrb[43].mxu1 }
0x287b   :  { %2748 = vpow2.f32 %v2310_v16 }
0x2885   :  { %v2749_v47 = vpop.eup %2748 }
0x2886   :  { %v1739_v46 = vadd.f32 1.0, %v2749_v47 }
0x2888   :  { %2750 = vrcp.f32 %v1739_v46 }
0x2892   :  { %v2751_v43 = vpop.eup %2750 }
0x2893   :  { %v1742_v48 = vmul.f32 2.0, %v2751_v43  ;;  %v1744_v10 = vmul.f32 %v2751_v43, %v1681_v61 }
0x2895   :  { %v2311_v11 = vadd.f32 -1.0, %v1742_v48 }
0x2897   :  { %1746 = vrot.lane.b32.xlu0 %v2311_v11, %s2788_s1 }
0x2909   :  { %v1747_v50 = vpop.permute.xlu0 %1746 }
0x290a   :  { %v1749_v51 = vmul.f32 %v2751_v43, %v1747_v50 }
0x290c   :  { %1751 = vrot.lane.b32.xlu0 %v1749_v51, %s2789_s3 }
0x297e   :  { %v1752_v19 = vpop.permute.xlu0 %1751 }
0x297f   :  { %v1754_v31 = vadd.f32 %v1752_v19, %v1744_v10 }
0x2981   :  { %2752 = vtanh.f32 %v1754_v31 }
0x298b   :  { %v2753_v53 = vpop.eup %2752 }
0x298c   :  { %1757 = vrot.lane.b32.xlu0 %v2753_v53, %s2788_s1 }
0x2990   :  { %1302 = vrot.lane.b32.xlu0 %v3212_v52, %s2789_s3  ;;  %v1468_v52 = vld [vmem:[#allocation2 + $0x30] sm:$0xff] }
0x2994   :  { %1458 = vrot.lane.b32.xlu0 %v1456_v54, %s2789_s3 }
0x29fe   :  { %v1758_v56 = vpop.permute.xlu0 %1757 }
0x29ff   :  { %v1760_v55 = vmul.f32 %v2751_v43, %v1758_v56 }
0x2a01   :  { %v1761_v57 = vpack.c.bf16 %v1760_v55, %v1760_v55 }
0x2a02   :  { %v1303_v58 = vpop.permute.xlu0 %1302 }
0x2a03   :  { %1305 = vst.msk [vmem:[#allocation2 + $0x28] sm:$0xff] %vm198_vm2, %v1303_v58  ;;  %1763 = vrot.lane.b32.xlu1 %v1761_v57, %s2789_s3 }
0x2a06   :  { %v1459_v59 = vpop.permute.xlu0 %1458 }
0x2a07   :  { %1461 = vst.msk [vmem:[#allocation2 + $0x38] sm:$0xff] %vm198_vm2, %v1459_v59 }
0x2a0a   :  { %v1467_v60 = vld [vmem:[#allocation2 + $0x28] sm:$0xff] }
0x2a0b   :  { %v1472_v62 = vpack.c.bf16 %v1467_v60, %v1466_v49 }
0x2a0d   :  { %2554 = vmatprep.mubr.msk.bf16.mxu0 %vm198_vm2, %v1472_v62 }
0x2a0e   :  { %v1469_v63 = vld [vmem:[#allocation2 + $0x38] sm:$0xff] }
0x2a0f   :  { %v1473_v0 = vpack.c.bf16 %v1469_v63, %v1468_v52 }
0x2a11   :  { %2555 = vmatmul.mubr.msk.bf16.gmra.mrb[40].mxu0 %vm198_vm2, %v1473_v0 }
0x2a12   :  { %2578 = vmatprep.mubr.msk.bf16.mxu0 %vm2791_vm1, %v2790_v20 }
0x2a75   :  { %v1764_v1 = vpop.permute.xlu1 %1763 }
0x2a76   :  { %2579 = vmatmul.mubr.msk.bf16.vlgmr.msra.gmra.mrb[44].mxu0 %vm198_vm2, %v1764_v1 }
0x2a77   :  { %2591 = vmatpush3.bf16.msra.mxu0 %v3256_v13  ;;  %2594 = vmatprep.mubr.msk.bf16.mxu0 %vm2791_vm1, %v2790_v20 }
0x2a78   :  { %2592 = vmatprep.subr.bf16.mxu0 %v2790_v20 }
0x2a7b   :  { %2593 = vmatpush3.bf16.msra.mxu0 %v3263_v42 }
0x2a7c   :  { %2606 = vmatprep.subr.bf16.mxu0 %v2790_v20 }
0x2ae4   :  { %v3335_v2 = vpop.f32.mrb[40].mxu0 }
0x2ae5   :  { %v1559_v44 = vpop.f32.mrb[41].mxu0 }
0x2ae6   :  { %v3337_v40 = vpop.f32.mrb[42].mxu0  ;;  %v1560_v34 = vadd.f32 %v3231_v21, %v1559_v44 }
0x2ae7   :  { %v3339_v4 = vpop.f32.mrb[43].mxu0 }
0x2ae8   :  { %v1563_v56 = vadd.f32 %v3231_v21, %v3339_v4 }
0x2b49   :  { %v1802_v6 = vpop.f32.mrb[44].mxu0 }
0x2b4a   :  { %v1808_v8 = vadd.f32 %v1802_v6, %v1555_v5  ;;  %v2580_v12 = vpop.f32.mrb[45].mxu0 }
0x2b4b   :  { %v1805_v22 = vpop.f32.mrb[46].mxu0 }
0x2b4c   :  { %v2313_v3 = vmul.f32 -1.442695, %v1808_v8  ;;  %v2581_v61 = vpop.f32.mrb[47].mxu0 }
0x2b4d   :  { %v1568_v61 = vadd.f32 %v3335_v2, %v3231_v21 }
0x2b4e   :  { %2754 = vpow2.f32 %v2313_v3 }
0x2b58   :  { %v2755_v18 = vpop.eup %2754 }
0x2b59   :  { %v1812_v17 = vadd.f32 1.0, %v2755_v18 }
0x2b5b   :  { %2756 = vrcp.f32 %v1812_v17 }
0x2b65   :  { %v2757_v23 = vpop.eup %2756 }
0x2b66   :  { %v1815_v24 = vmul.f32 2.0, %v2757_v23  ;;  %v1817_v14 = vmul.f32 %v2757_v23, %v1754_v31 }
0x2b68   :  { %v2314_v26 = vadd.f32 -1.0, %v1815_v24 }
0x2b6a   :  { %1819 = vrot.lane.b32.xlu0 %v2314_v26, %s2788_s1 }
0x2bdc   :  { %v1820_v25 = vpop.permute.xlu0 %1819 }
0x2bdd   :  { %v1822_v45 = vmul.f32 %v2757_v23, %v1820_v25 }
0x2bdf   :  { %1824 = vrot.lane.b32.xlu1 %v1822_v45, %s2789_s3 }
0x2c51   :  { %v1825_v9 = vpop.permute.xlu1 %1824 }
0x2c52   :  { %v1827_v28 = vadd.f32 %v1825_v9, %v1817_v14 }
0x2c54   :  { %2758 = vtanh.f32 %v1827_v28 }
0x2c5e   :  { %v2759_v29 = vpop.eup %2758 }
0x2c5f   :  { %1830 = vrot.lane.b32.xlu0 %v2759_v29, %s2788_s1 }
0x2cd1   :  { %v1831_v30 = vpop.permute.xlu0 %1830 }
0x2cd2   :  { %v1833_v32 = vmul.f32 %v2757_v23, %v1831_v30 }
0x2cd4   :  { %v1834_v33 = vpack.c.bf16 %v1833_v32, %v1833_v32 }
0x2cd6   :  { %1836 = vrot.lane.b32.xlu1 %v1834_v33, %s2789_s3 }
0x2d48   :  { %v1837_v7 = vpop.permute.xlu1 %1836 }
0x2d49   :  { %2587 = vmatmul.mubr.msk.bf16.vlgmr.msra.gmra.mrb[44].mxu1 %vm198_vm2, %v1837_v7 }
0x2d4a   :  { %2599 = vmatpush3.bf16.msra.mxu1 %v3256_v13  ;;  %2602 = vmatprep.mubr.msk.bf16.mxu1 %vm2791_vm1, %v2790_v20 }
0x2d4b   :  { %2600 = vmatprep.subr.bf16.mxu1 %v2790_v20 }
0x2d4e   :  { %2601 = vmatpush3.bf16.msra.mxu1 %v3263_v42 }
0x2d4f   :  { %2614 = vmatprep.subr.mxu1 %v2790_v20 }
0x2e1c   :  { %v1875_v35 = vpop.f32.mrb[44].mxu1 }
0x2e1d   :  { %v1881_v27 = vadd.f32 %v1875_v35, %v1560_v34  ;;  %v2588_v36 = vpop.f32.mrb[45].mxu1 }
0x2e1e   :  { %v1878_v37 = vpop.f32.mrb[46].mxu1 }
0x2e1f   :  { %v2316_v15 = vmul.f32 -1.442695, %v1881_v27  ;;  %v2589_v38 = vpop.f32.mrb[47].mxu1  ;;  %v1571_v37 = vadd.f32 %v3337_v40, %v3231_v21 }
0x2e21   :  { %2760 = vpow2.f32 %v2316_v15 }
0x2e2b   :  { %v2761_v39 = vpop.eup %2760 }
0x2e2c   :  { %v1885_v16 = vadd.f32 1.0, %v2761_v39 }
0x2e2e   :  { %2762 = vrcp.f32 %v1885_v16 }
0x2e38   :  { %v2763_v41 = vpop.eup %2762 }
0x2e39   :  { %v1888_v47 = vmul.f32 2.0, %v2763_v41  ;;  %v1890_v11 = vmul.f32 %v2763_v41, %v1827_v28 }
0x2e3b   :  { %v2317_v46 = vadd.f32 -1.0, %v1888_v47 }
0x2e3d   :  { %1892 = vrot.lane.b32.xlu0 %v2317_v46, %s2788_s1 }
0x2eaf   :  { %v1893_v43 = vpop.permute.xlu0 %1892 }
0x2eb0   :  { %v1895_v48 = vmul.f32 %v2763_v41, %v1893_v43 }
0x2eb2   :  { %1897 = vrot.lane.b32.xlu1 %v1895_v48, %s2789_s3 }
0x2f24   :  { %v1898_v50 = vpop.permute.xlu1 %1897 }
0x2f25   :  { %v1900_v51 = vadd.f32 %v1898_v50, %v1890_v11 }
0x2f27   :  { %2764 = vtanh.f32 %v1900_v51 }
0x2f31   :  { %v2765_v10 = vpop.eup %2764 }
0x2f32   :  { %1903 = vrot.lane.b32.xlu0 %v2765_v10, %s2788_s1 }
0x2fa4   :  { %v1904_v19 = vpop.permute.xlu0 %1903 }
0x2fa5   :  { %v1906_v31 = vmul.f32 %v2763_v41, %v1904_v19 }
0x2fa7   :  { %v1907_v53 = vpack.c.bf16 %v1906_v31, %v1906_v31 }
0x2fa9   :  { %1909 = vrot.lane.b32.xlu1 %v1907_v53, %s2789_s3  ;;  %v2792_v53 = vmov 0  }
0x2faa   :  { %2624 = vset.pattern.permute.xlu0 %v2792_v53 }
0x301b   :  { %v1910_v54 = vpop.permute.xlu1 %1909 }
0x301c   :  { %2595 = vmatmul.mubr.msk.bf16.vlgmr.msra.gmra.mrb[48].mxu0 %vm198_vm2, %v1910_v54  ;;  %v17_v54 = vstv %s3408_s11 }
0x301d   :  { %2607 = vmatpush3.bf16.msra.mxu0 %v3256_v13  ;;  %2610 = vmatprep.mubr.msk.bf16.mxu0 %vm2791_vm1, %v2790_v20  ;;  %18 = vst [vmem:[#allocation3] sm:$0x1] %v17_v54 }
0x301e   :  { %2608 = vmatprep.subr.bf16.mxu0 %v2790_v20 }
0x3021   :  { %2609 = vmatpush3.bf16.msra.mxu0 %v3263_v42 }
0x30ef   :  { %v1948_v55 = vpop.f32.mrb[48].mxu0 }
0x30f0   :  { %v1954_v57 = vadd.f32 %v1948_v55, %v1563_v56  ;;  %v2596_v58 = vpop.f32.mrb[49].mxu0 }
0x30f1   :  { %v1951_v59 = vpop.f32.mrb[50].mxu0 }
0x30f2   :  { %v2319_v49 = vmul.f32 -1.442695, %v1954_v57  ;;  %v2597_v60 = vpop.f32.mrb[51].mxu0  ;;  %v2205_v57 = vld [vmem:[#allocation3] sm:$0x1] }
0x30f3   :  { %v2126_v59 = vld [vmem:[%s3409_s10] sm:$0xff] }
0x30f4   :  { %2766 = vpow2.f32 %v2319_v49  ;;  %v2211_v49 = vlaneseq }
0x30f6   :  { %v2212_v60 = vshrl.u32 %v2211_v49, 7 }
0x30fe   :  { %v2767_v62 = vpop.eup %2766 }
0x30ff   :  { %v1958_v52 = vadd.f32 1.0, %v2767_v62  ;;  %v2213_v62 = vsub.s32 0, %v2212_v60 }
0x3101   :  { %2768 = vrcp.f32 %v1958_v52 }
0x310b   :  { %v2769_v13 = vpop.eup %2768 }
0x310c   :  { %v1961_v63 = vmul.f32 2.0, %v2769_v13  ;;  %v1963_v44 = vmul.f32 %v2769_v13, %v1900_v51 }
0x310e   :  { %v2320_v0 = vadd.f32 -1.0, %v1961_v63 }
0x3110   :  { %1965 = vrot.lane.b32.xlu0 %v2320_v0, %s2788_s1 }
0x3182   :  { %v1966_v1 = vpop.permute.xlu0 %1965 }
0x3183   :  { %v1968_v42 = vmul.f32 %v2769_v13, %v1966_v1 }
0x3185   :  { %1970 = vrot.lane.b32.xlu1 %v1968_v42, %s2789_s3 }
0x31f7   :  { %v1971_v4 = vpop.permute.xlu1 %1970 }
0x31f8   :  { %v1973_v5 = vadd.f32 %v1971_v4, %v1963_v44 }
0x31fa   :  { %2770 = vtanh.f32 %v1973_v5 }
0x3204   :  { %v2771_v6 = vpop.eup %2770 }
0x3205   :  { %1976 = vrot.lane.b32.xlu0 %v2771_v6, %s2788_s1 }
0x3277   :  { %v1977_v8 = vpop.permute.xlu0 %1976 }
0x3278   :  { %v1979_v12 = vmul.f32 %v2769_v13, %v1977_v8 }
0x327a   :  { %v1980_v22 = vpack.c.bf16 %v1979_v12, %v1979_v12 }
0x327c   :  { %1982 = vrot.lane.b32.xlu1 %v1980_v22, %s2789_s3 }
0x32ee   :  { %v1983_v3 = vpop.permute.xlu1 %1982 }
0x32ef   :  { %2603 = vmatmul.mubr.msk.bf16.vlgmr.msra.gmra.mrb[48].mxu1 %vm198_vm2, %v1983_v3 }
0x32f0   :  { %2616 = vmatprep.mubr.msk.f32.mxu1 %vm2791_vm1, %v2790_v20 }
0x33c2   :  { %v2021_v18 = vpop.f32.mrb[48].mxu1 }
0x33c3   :  { %v2027_v17 = vadd.f32 %v2021_v18, %v1568_v61  ;;  %v2604_v23 = vpop.f32.mrb[49].mxu1 }
0x33c4   :  { %v2024_v24 = vpop.f32.mrb[50].mxu1 }
0x33c5   :  { %v2322_v26 = vmul.f32 -1.442695, %v2027_v17  ;;  %v2605_v25 = vpop.f32.mrb[51].mxu1 }
0x33c7   :  { %2772 = vpow2.f32 %v2322_v26 }
0x33d1   :  { %v2773_v45 = vpop.eup %2772 }
0x33d2   :  { %v2031_v14 = vadd.f32 1.0, %v2773_v45 }
0x33d4   :  { %2774 = vrcp.f32 %v2031_v14 }
0x33de   :  { %v2775_v9 = vpop.eup %2774 }
0x33df   :  { %v2034_v28 = vmul.f32 2.0, %v2775_v9  ;;  %v2036_v2 = vmul.f32 %v2775_v9, %v1973_v5 }
0x33e1   :  { %v2323_v29 = vadd.f32 -1.0, %v2034_v28 }
0x33e3   :  { %2038 = vrot.lane.b32.xlu0 %v2323_v29, %s2788_s1 }
0x3455   :  { %v2039_v30 = vpop.permute.xlu0 %2038 }
0x3456   :  { %v2041_v20 = vmul.f32 %v2775_v9, %v2039_v30 }
0x3458   :  { %2043 = vrot.lane.b32.xlu1 %v2041_v20, %s2789_s3 }
0x34ca   :  { %v2044_v32 = vpop.permute.xlu1 %2043 }
0x34cb   :  { %v2046_v33 = vadd.f32 %v2044_v32, %v2036_v2 }
0x34cd   :  { %2776 = vtanh.f32 %v2046_v33 }
0x34d7   :  { %v2777_v7 = vpop.eup %2776 }
0x34d8   :  { %2049 = vrot.lane.b32.xlu0 %v2777_v7, %s2788_s1 }
0x354a   :  { %v2050_v34 = vpop.permute.xlu0 %2049 }
0x354b   :  { %v2052_v35 = vmul.f32 %v2775_v9, %v2050_v34 }
0x354d   :  { %v2053_v27 = vpack.c.bf16 %v2052_v35, %v2052_v35 }
0x354f   :  { %2055 = vrot.lane.b32.xlu1 %v2053_v27, %s2789_s3 }
0x35c1   :  { %v2056_v36 = vpop.permute.xlu1 %2055 }
0x35c2   :  { %2611 = vmatmul.mubr.msk.bf16.vlgmr.msra.gmra.mrb[52].mxu0 %vm198_vm2, %v2056_v36 }
0x3695   :  { %v2094_v15 = vpop.f32.mrb[52].mxu0 }
0x3696   :  { %v2100_v38 = vadd.f32 %v2094_v15, %v1571_v37  ;;  %v2612_v39 = vpop.f32.mrb[53].mxu0 }
0x3697   :  { %v2097_v16 = vpop.f32.mrb[54].mxu0 }
0x3698   :  { %v2325_v41 = vmul.f32 -1.442695, %v2100_v38  ;;  %v2613_v47 = vpop.f32.mrb[55].mxu0 }
0x369a   :  { %2778 = vpow2.f32 %v2325_v41 }
0x36a4   :  { %v2779_v46 = vpop.eup %2778 }
0x36a5   :  { %v2104_v43 = vadd.f32 1.0, %v2779_v46 }
0x36a7   :  { %2780 = vrcp.f32 %v2104_v43 }
0x36b1   :  { %v2781_v48 = vpop.eup %2780 }
0x36b2   :  { %v2107_v11 = vmul.f32 2.0, %v2781_v48  ;;  %v2109_v21 = vmul.f32 %v2781_v48, %v2046_v33 }
0x36b4   :  { %v2326_v50 = vadd.f32 -1.0, %v2107_v11 }
0x36b6   :  { %2111 = vrot.lane.b32.xlu0 %v2326_v50, %s2788_s1 }
0x3728   :  { %v2112_v51 = vpop.permute.xlu0 %2111 }
0x3729   :  { %v2114_v10 = vmul.f32 %v2781_v48, %v2112_v51 }
0x372b   :  { %2116 = vrot.lane.b32.xlu1 %v2114_v10, %s2789_s3 }
0x379d   :  { %v2117_v40 = vpop.permute.xlu1 %2116 }
0x379e   :  { %v2119_v19 = vadd.f32 %v2117_v40, %v2109_v21 }
0x37a0   :  { %2782 = vtanh.f32 %v2119_v19 }
0x37aa   :  { %v2783_v31 = vpop.eup %2782 }
0x37ab   :  { %2122 = vrot.lane.b32.xlu0 %v2783_v31, %s2788_s1 }
0x37af   :  { %2208 = vperm.xlu0 %2624, %v2205_v57  }
0x381d   :  { %v2123_v56 = vpop.permute.xlu0 %2122 }
0x381e   :  { %v2125_v55 = vmul.f32 %v2781_v48, %v2123_v56 }
0x3820   :  { %2128 = vrot.lane.b32.xlu1 %v2125_v55, %s2789_s3 }
0x382e   :  { %v2209_v52 = vpop.permute.xlu0 %2208 }
0x382f   :  { %v2214_v13 = vrot.slane %v2209_v52, %v2213_v62 }
0x3892   :  { %v2129_v58 = vpop.permute.xlu1 %2128 }
0x3893   :  { %2615 = vmatpush3.xpose.msk.msra.mxu1 %vm198_vm2, %v2129_v58 }
0x3896   :  { %2617 = vmatmul.mubr.msk.f32.vlgmr.msra.gmra.mrb[52].mxu1 %vm198_vm2, %v2126_v59 }
0x3969   :  { %v2201_v63 = vpop.f32.mrb[52].mxu1 }
0x396a   :  { %v2215_v0 = vadd.f32 %v2214_v13, %v2201_v63  ;;  %v2618_v1 = vpop.f32.mrb[53].mxu1 }
0x396c   :  { %v2329_v42 = vmul.f32 -1.442695, %v2215_v0 }
0x396e   :  { %2784 = vpow2.f32 %v2329_v42 }
0x3978   :  { %v2785_v44 = vpop.eup %2784 }
0x3979   :  { %v2219_v4 = vadd.f32 1.0, %v2785_v44 }
0x397b   :  { %2786 = vrcp.f32 %v2219_v4 }
0x3985   :  { %v2787_v5 = vpop.eup %2786 }
0x3986   :  { %2223 = vst.msk [vmem:[%s3410_s12] sm:$0x1] %vm2222_vm3, %v2787_v5 }

</bundles_post_ra>
